<compile_context>
chip_gen: v7x
topology: tpu7x:2x2x1
jax: 0.10.0
libtpu: 0.0.40
codegen_flags: <defaults>
</compile_context>

<pallas_src>
import jax
import jax.numpy as jnp
from jax import lax
from jax.experimental import pallas as pl
from jax.experimental.pallas import tpu as pltpu


def _make_mamba_kernel(CH, SUB, d_model, d_inner, d_state, d_conv, eps=1e-5):
    assert CH % SUB == 0
    n_sub = CH // SUB
    tail = d_conv - 1

    def kernel(x_ref, gamma_ref, beta_ref, w_in_ref, conv_w_ref, conv_b_ref,
               w_dtx_ref, b_dt_ref, a_ref, dpar_ref, w_out_ref,
               o_ref,
               tail_ref, xpad_ref, xc_ref, xg_ref, delta_ref, bp_ref, cp_ref,
               da_ref, h_ref, ssm_ref):
        c = pl.program_id(1)                          # sequence-chunk index (serial axis)

        def sigmoid(v):                               # exact: the recurrence amplifies error
            return 1.0 / (1.0 + jnp.exp(-v))

        x = x_ref[0]                                  # (CH, d_model) f32

        # ---- LayerNorm (biased variance, eps=1e-5, affine) ----
        mu = jnp.mean(x, axis=-1, keepdims=True)
        xm = x - mu
        var = jnp.mean(xm * xm, axis=-1, keepdims=True)
        xn = xm * lax.rsqrt(var + eps) * gamma_ref[...] + beta_ref[...]

        # ---- in_proj: bf16 operands, f32 accumulation on the MXU ----
        proj = jnp.dot(xn.astype(jnp.bfloat16), w_in_ref[...],
                       preferred_element_type=jnp.float32)        # (CH, 2*d_inner)
        x_pre = proj[:, :d_inner]
        xg_ref[...] = proj[:, d_inner:]               # park the gate path in VMEM

        # ---- causal depthwise conv1d; the (d_conv-1)-row tail is carried across chunks ----
        @pl.when(c == 0)
        def _():
            tail_ref[...] = jnp.zeros_like(tail_ref)

        xpad_ref[0:tail, :] = tail_ref[...]
        xpad_ref[tail:, :] = x_pre
        tail_ref[...] = x_pre[CH - tail:, :]          # carry for the next chunk

        xwin = xpad_ref[...]                          # single load of the padded window
        conv = jnp.zeros((CH, d_inner), jnp.float32) + conv_b_ref[...]
        for k in range(d_conv):                       # static taps, sliced from the value
            conv = conv + xwin[k:k + CH, :] * conv_w_ref[k:k + 1, :]
        xc = conv * sigmoid(conv)                     # SiLU
        xc_ref[...] = xc

        # ---- fused dt_proj + x_proj (one MXU launch, then slice dt / B / C) ----
        fused = jnp.dot(xc.astype(jnp.bfloat16), w_dtx_ref[...],
                        preferred_element_type=jnp.float32)       # (CH, d_inner + 2*d_state)
        dt = fused[:, :d_inner] + b_dt_ref[...]
        delta_ref[...] = jnp.where(                   # softplus, threshold 20
            dt > 20.0, dt, jnp.log(1.0 + jnp.exp(jnp.minimum(dt, 20.0))))
        bp_ref[...] = fused[:, d_inner:d_inner + d_state]
        cp_ref[...] = fused[:, d_inner + d_state:]

        # ---- selective scan: VPU/XLU on the serial path, EUP exp pipelined per sub-block ----
        @pl.when(c == 0)
        def _():
            h_ref[...] = jnp.zeros_like(h_ref)

        a_col = a_ref[...]                            # (d_state, 1)

        def fill_da(s, slot):
            # dA for sub-block s into buffer `slot`; independent of the scan chain.
            base = s * SUB
            dblk = delta_ref[pl.ds(base, SUB), :]     # (SUB, d_inner) of delta
            for j in range(SUB):
                # TODO(synk): on v6e/v7x compute/store dA in bf16 (halves EUP + load traffic).
                da_ref[slot * SUB + j] = jnp.exp(a_col * dblk[j:j + 1, :])

        fill_da(0, 0)                                 # prime slot 0

        def scan_body(s, carry):
            base = pl.multiple_of(s * SUB, SUB)
            slot = s % 2

            @pl.when(s + 1 < n_sub)
            def _():                                  # next sub-block's exp overlaps this scan
                fill_da(s + 1, 1 - slot)

            dxb = delta_ref[pl.ds(base, SUB), :] * xc_ref[pl.ds(base, SUB), :]
            bT = bp_ref[pl.ds(base, SUB), :].T        # (d_state, SUB): one transpose / SUB steps
            cT = cp_ref[pl.ds(base, SUB), :].T

            h = h_ref[...]                            # keep h in vregs across the SUB unroll
            for j in range(SUB):
                h = da_ref[slot * SUB + j] * h + bT[:, j:j + 1] * dxb[j:j + 1, :]
                # y_j[d] = sum_s C_j[s] * h[s, d]; store each row immediately (low vreg pressure)
                ssm_ref[pl.ds(base + j, 1), :] = jnp.sum(cT[:, j:j + 1] * h,
                                                         axis=0, keepdims=True)
            h_ref[...] = h
            return carry

        lax.fori_loop(0, n_sub, scan_body, 0)

        # ---- skip (D), gate with SiLU(x_gate), out_proj, residual ----
        # TODO(synk): optionally defer out_proj by one chunk so this MXU work hides under the
        #             next chunk's VALU-bound scan.
        xg = xg_ref[...]
        out = (ssm_ref[...] + xc_ref[...] * dpar_ref[...]) * (xg * sigmoid(xg))
        y = jnp.dot(out.astype(jnp.bfloat16), w_out_ref[...],
                    preferred_element_type=jnp.float32)
        o_ref[0] = (y + x).astype(o_ref.dtype)

    return kernel


def _vmem_need_bytes(CH, SUB, d_model, d_inner, d_state, d_conv):
    f32 = 4
    scratch = f32 * ((d_conv - 1) * d_inner                 # conv tail carry
                     + (CH + d_conv - 1) * d_inner          # padded conv window
                     + 4 * CH * d_inner                     # xc, x_gate, delta, ssm
                     + 2 * CH * d_state                     # B, C projections
                     + 2 * SUB * d_state * d_inner          # dA double buffer
                     + d_state * d_inner)                   # hidden state h
    weights = 2 * (d_model * 2 * d_inner                    # w_in (bf16, single-buffered)
                   + d_inner * (d_inner + 2 * d_state)      # fused dt/x proj
                   + d_inner * d_model)                     # w_out
    small = 2 * f32 * (2 * d_model + (d_conv + 3) * d_inner + d_state)
    io = 2 * 2 * CH * d_model * f32                         # double-buffered in/out blocks
    return scratch + weights + small + io


def _pick_seq_chunk(L, d_model, d_inner, d_state, d_conv, budget):
    for cand in (256, 128, 64, 32, 16, 8):                  # 256 helps v6e/v7x 256-wide MXUs
        if L % cand != 0:
            continue
        sub = 8 if cand % 8 == 0 else cand
        if _vmem_need_bytes(cand, sub, d_model, d_inner, d_state, d_conv) <= budget:
            return cand
    return L


def mamba_block_forward(x, params, *, seq_chunk=None):
    (gamma, beta, w_in, conv_w, conv_b, w_dt, b_dt, w_x,
     a_col, d_par, w_out) = params
    B, L, D = x.shape
    d_inner = w_dt.shape[0]
    d_state = a_col.shape[0]
    d_conv = conv_w.shape[0]

    if seq_chunk is None:
        try:                                                # per-generation VMEM budget
            vmem_cap = int(pltpu.get_tpu_info().vmem_capacity_bytes)
        except Exception:
            vmem_cap = 64 * 1024 * 1024
        seq_chunk = _pick_seq_chunk(L, D, d_inner, d_state, d_conv, (3 * vmem_cap) // 4)
    CH = seq_chunk
    assert L % CH == 0, "sequence length must be divisible by seq_chunk"
    SUB = 8 if CH % 8 == 0 else CH                          # inner static unroll of the scan
    n_chunks = L // CH

    # bf16 weights for the MXU projections (accumulation stays f32 inside the kernel).
    w_in_b = w_in.astype(jnp.bfloat16)
    w_dtx_b = jnp.concatenate([w_dt, w_x], axis=1).astype(jnp.bfloat16)   # fused dt/x proj
    w_out_b = w_out.astype(jnp.bfloat16)

    kernel = _make_mamba_kernel(CH, SUB, D, d_inner, d_state, d_conv)

    def _const(arr, bufs=None):
        rank = arr.ndim
        idx = lambda b, c, _r=rank: (0,) * _r
        if bufs is None:
            return pl.BlockSpec(arr.shape, idx)
        # constant index map -> single buffer; recovers VMEM (review item).
        return pl.BlockSpec(arr.shape, idx, pipeline_mode=pl.Buffered(bufs))

    vmem_need = _vmem_need_bytes(CH, SUB, D, d_inner, d_state, d_conv)
    vmem_limit = int(min(max(vmem_need * 5 // 4 + (4 << 20), 32 << 20), 100 << 20))

    flops = int(
        2 * B * L * (D * 2 * d_inner + d_inner * (d_inner + 2 * d_state) + d_inner * D)
        + 2 * B * L * d_conv * d_inner
        + 6 * B * L * d_state * d_inner)
    transcendentals = int(B * L * (d_state * d_inner + 3 * d_inner))
    bytes_accessed = int(
        8 * x.size
        + 2 * (w_in.size + w_dt.size + w_x.size + w_out.size)
        + 4 * (gamma.size + beta.size + conv_w.size + conv_b.size
               + b_dt.size + a_col.size + d_par.size))

    # TODO(synk): v7x with B < 2: core-split the conv/scan/gate work over d_inner halves so
    #             both TensorCores are busy (the recurrence is independent per channel).
    # TODO(synk): for d_inner >= ~3072 keep the fused dt/x weight in HBM (pl.ANY) and K-tile
    #             the projection with pltpu.emit_pipeline instead of holding it resident.
    return pl.pallas_call(
        kernel,
        out_shape=jax.ShapeDtypeStruct((B, L, D), x.dtype),
        grid=(B, n_chunks),
        in_specs=[
            pl.BlockSpec((1, CH, D), lambda b, c: (b, c, 0)),
            _const(gamma), _const(beta),
            _const(w_in_b, bufs=1),
            _const(conv_w), _const(conv_b),
            _const(w_dtx_b, bufs=1),
            _const(b_dt), _const(a_col), _const(d_par),
            _const(w_out_b, bufs=1),
        ],
        out_specs=pl.BlockSpec((1, CH, D), lambda b, c: (b, c, 0)),
        scratch_shapes=[
            pltpu.VMEM((d_conv - 1, d_inner), jnp.float32),          # conv tail carry
            pltpu.VMEM((CH + d_conv - 1, d_inner), jnp.float32),     # padded conv window
            pltpu.VMEM((CH, d_inner), jnp.float32),                  # xc = SiLU(conv)
            pltpu.VMEM((CH, d_inner), jnp.float32),                  # x_gate
            pltpu.VMEM((CH, d_inner), jnp.float32),                  # delta
            pltpu.VMEM((CH, d_state), jnp.float32),                  # B projection
            pltpu.VMEM((CH, d_state), jnp.float32),                  # C projection
            pltpu.VMEM((2 * SUB, d_state, d_inner), jnp.float32),    # dA, 2-deep per-sub-block
            pltpu.VMEM((d_state, d_inner), jnp.float32),             # hidden state h (carried)
            pltpu.VMEM((CH, d_inner), jnp.float32),                  # per-step SSM outputs
        ],
        compiler_params=pltpu.CompilerParams(
            dimension_semantics=("parallel", "arbitrary"),
            vmem_limit_bytes=vmem_limit),
        cost_estimate=pl.CostEstimate(
            flops=flops, transcendentals=transcendentals,
            bytes_accessed=bytes_accessed),
    )(x, gamma, beta, w_in_b, conv_w, conv_b, w_dtx_b, b_dt, a_col, d_par, w_out_b)


def init_params(key, d_model, d_state, d_conv, expand):
    d_inner = expand * d_model
    ks = jax.random.split(key, 6)
    gamma = jnp.ones((1, d_model), jnp.float32)                       # LayerNorm weight
    beta = jnp.zeros((1, d_model), jnp.float32)                       # LayerNorm bias
    w_in = jax.random.normal(ks[0], (d_model, 2 * d_inner), jnp.float32) / jnp.sqrt(d_model)
    conv_w = jax.random.normal(ks[1], (d_conv, d_inner), jnp.float32) / jnp.sqrt(d_conv)
    conv_b = 0.1 * jax.random.normal(ks[2], (1, d_inner), jnp.float32)
    w_dt = jax.random.normal(ks[3], (d_inner, d_inner), jnp.float32) / jnp.sqrt(d_inner)
    b_dt = jnp.full((1, d_inner), -5.0, jnp.float32)                  # nn.init.constant_(bias, -5)
    w_x = jax.random.normal(ks[4], (d_inner, 2 * d_state), jnp.float32) / jnp.sqrt(d_inner)
    # A = +arange(1..d_state), faithful to the reference module (canonical Mamba uses -A,
    # so with this A the state grows with L; outputs are compared with a relative tolerance).
    a_col = jnp.arange(1, d_state + 1, dtype=jnp.float32).reshape(d_state, 1)
    d_par = jnp.ones((1, d_inner), jnp.float32)                       # D = ones
    w_out = jax.random.normal(ks[5], (d_inner, d_model), jnp.float32) / jnp.sqrt(d_inner)
    return (gamma, beta, w_in, conv_w, conv_b, w_dt, b_dt, w_x, a_col, d_par, w_out)


def _mm(a, w):
    """Matmul with bf16 operands / f32 accumulation (mirrors the kernel's MXU path)."""
    return jnp.dot(a.astype(jnp.bfloat16), w.astype(jnp.bfloat16),
                   preferred_element_type=jnp.float32)


def _sigmoid(v):
    return 1.0 / (1.0 + jnp.exp(-v))


def reference_forward(x, params):
    """Pure-JAX re-implementation of the PyTorch MambaBlock forward (for verification)."""
    (gamma, beta, w_in, conv_w, conv_b, w_dt, b_dt, w_x,
     a_col, d_par, w_out) = params
    Bn, L, D = x.shape
    d_inner = w_dt.shape[0]
    d_state = a_col.shape[0]
    d_conv = conv_w.shape[0]

    mu = x.mean(-1, keepdims=True)
    var = ((x - mu) ** 2).mean(-1, keepdims=True)
    xn = (x - mu) / jnp.sqrt(var + 1e-5) * gamma[0] + beta[0]

    proj = _mm(xn, w_in)
    x_pre, x_gate = proj[..., :d_inner], proj[..., d_inner:]

    x_pad = jnp.pad(x_pre, ((0, 0), (d_conv - 1, 0), (0, 0)))
    conv = conv_b[0] + sum(x_pad[:, k:k + L, :] * conv_w[k] for k in range(d_conv))
    xc = conv * _sigmoid(conv)

    dt = _mm(xc, w_dt) + b_dt[0]
    delta = jnp.where(dt > 20.0, dt, jnp.log(1.0 + jnp.exp(jnp.minimum(dt, 20.0))))

    xp = _mm(xc, w_x)
    Bp, Cp = xp[..., :d_state], xp[..., d_state:]
    A = a_col[:, 0]
    dA = jnp.exp(delta[..., None] * A)                                # (B, L, d_inner, d_state)
    dBx = delta[..., None] * Bp[:, :, None, :] * xc[..., None]

    def step(h, inp):
        dA_t, dBx_t, C_t = inp
        h = dA_t * h + dBx_t
        y = jnp.einsum('bs,bds->bd', C_t, h)
        return h, y

    h0 = jnp.zeros((Bn, d_inner, d_state), jnp.float32)
    _, ys = jax.lax.scan(step, h0,
                         (dA.swapaxes(0, 1), dBx.swapaxes(0, 1), Cp.swapaxes(0, 1)))
    ssm = ys.swapaxes(0, 1)

    out = (ssm + xc * d_par[0]) * (x_gate * _sigmoid(x_gate))
    return _mm(out, w_out) + x


if __name__ == "__main__":
    key = jax.random.PRNGKey(0)
    kx, kp = jax.random.split(key)
    B, L = 2, 32
    d_model, d_state, d_conv, expand = 32, 16, 4, 2

    params = init_params(kp, d_model, d_state, d_conv, expand)
    x = jax.random.normal(kx, (B, L, d_model), jnp.float32)

    y_ref = reference_forward(x, params)

    # seq_chunk=16 -> 2 sequence chunks (exercises the carried h / conv tail) and 2 sub-blocks
    # per chunk (exercises the 2-deep dA pipeline); seq_chunk=32 -> single chunk baseline.
    y_chunked = jax.block_until_ready(mamba_block_forward(x, params, seq_chunk=16))
    y_single = jax.block_until_ready(mamba_block_forward(x, params, seq_chunk=32))

    assert y_chunked.shape == (B, L, d_model)
    assert bool(jnp.all(jnp.isfinite(y_chunked)))
    assert bool(jnp.all(jnp.isfinite(y_single)))

    def check(a, b, rtol, atol, what):
        # combined rel+abs tolerance: the module's A > 0 makes outputs O(1e2), so a pure
        # absolute comparison would amplify benign ulp-level differences.
        excess = float(jnp.max(jnp.abs(a - b) - (atol + rtol * jnp.abs(b))))
        assert excess <= 0.0, f"{what}: tolerance exceeded by {excess}"

    check(y_chunked, y_ref, 2e-2, 2e-2, "chunked kernel vs reference")
    check(y_single, y_ref, 2e-2, 2e-2, "single-chunk kernel vs reference")
    print("KERNEL_OK")
</pallas_src>

<mosaic_0001>
module attributes {stable_mosaic.version = 11 : i64} {
  func.func @kernel(%arg0: i32, %arg1: i32, %arg2: memref<1x16x32xf32, #tpu.memory_space<vmem>>, %arg3: memref<1x32xf32, #tpu.memory_space<vmem>>, %arg4: memref<1x32xf32, #tpu.memory_space<vmem>>, %arg5: memref<32x128xbf16, #tpu.memory_space<vmem>>, %arg6: memref<4x64xf32, #tpu.memory_space<vmem>>, %arg7: memref<1x64xf32, #tpu.memory_space<vmem>>, %arg8: memref<64x96xbf16, #tpu.memory_space<vmem>>, %arg9: memref<1x64xf32, #tpu.memory_space<vmem>>, %arg10: memref<16x1xf32, #tpu.memory_space<vmem>>, %arg11: memref<1x64xf32, #tpu.memory_space<vmem>>, %arg12: memref<64x32xbf16, #tpu.memory_space<vmem>>, %arg13: memref<1x16x32xf32, #tpu.memory_space<vmem>>, %arg14: memref<3x64xf32, #tpu.memory_space<vmem>>, %arg15: memref<19x64xf32, #tpu.memory_space<vmem>>, %arg16: memref<16x64xf32, #tpu.memory_space<vmem>>, %arg17: memref<16x64xf32, #tpu.memory_space<vmem>>, %arg18: memref<16x64xf32, #tpu.memory_space<vmem>>, %arg19: memref<16x16xf32, #tpu.memory_space<vmem>>, %arg20: memref<16x16xf32, #tpu.memory_space<vmem>>, %arg21: memref<16x16x64xf32, #tpu.memory_space<vmem>>, %arg22: memref<16x64xf32, #tpu.memory_space<vmem>>, %arg23: memref<16x64xf32, #tpu.memory_space<vmem>>) attributes {dimension_semantics = [#tpu.dimension_semantics<parallel>, #tpu.dimension_semantics<arbitrary>], iteration_bounds = array<i64: 2, 2>, scalar_prefetch = 0 : i64, scratch_operands = 10 : i64, tpu.core_type = #tpu.core_type<tc>, window_params = [{transform_indices = @transform_0, window_bounds = array<i64: 1, 16, 32>}, {pipeline_mode = #tpu.pipeline_mode<synchronous>, transform_indices = @transform_1, window_bounds = array<i64: 1, 32>}, {pipeline_mode = #tpu.pipeline_mode<synchronous>, transform_indices = @transform_2, window_bounds = array<i64: 1, 32>}, {pipeline_mode = #tpu.pipeline_mode<synchronous>, transform_indices = @transform_3, window_bounds = array<i64: 32, 128>}, {pipeline_mode = #tpu.pipeline_mode<synchronous>, transform_indices = @transform_4, window_bounds = array<i64: 4, 64>}, {pipeline_mode = #tpu.pipeline_mode<synchronous>, transform_indices = @transform_5, window_bounds = array<i64: 1, 64>}, {pipeline_mode = #tpu.pipeline_mode<synchronous>, transform_indices = @transform_6, window_bounds = array<i64: 64, 96>}, {pipeline_mode = #tpu.pipeline_mode<synchronous>, transform_indices = @transform_7, window_bounds = array<i64: 1, 64>}, {pipeline_mode = #tpu.pipeline_mode<synchronous>, transform_indices = @transform_8, window_bounds = array<i64: 16, 1>}, {pipeline_mode = #tpu.pipeline_mode<synchronous>, transform_indices = @transform_9, window_bounds = array<i64: 1, 64>}, {pipeline_mode = #tpu.pipeline_mode<synchronous>, transform_indices = @transform_10, window_bounds = array<i64: 64, 32>}, {transform_indices = @transform_11, window_bounds = array<i64: 1, 16, 32>}]} {
    %c0 = arith.constant 0 : index
    %c0_0 = arith.constant 0 : index
    %c0_1 = arith.constant 0 : index
    %0 = vector.load %arg2[%c0, %c0_0, %c0_1] : memref<1x16x32xf32, #tpu.memory_space<vmem>>, vector<1x16x32xf32>
    %1 = vector.shape_cast %0 : vector<1x16x32xf32> to vector<16x32xf32>
    %cst = arith.constant dense<0.000000e+00> : vector<16xf32>
    %2 = vector.multi_reduction <add>, %1, %cst [1] : vector<16x32xf32> to vector<16xf32>
    %3 = vector.shape_cast %2 : vector<16xf32> to vector<16x1xf32>
    %cst_2 = arith.constant 3.200000e+01 : f32
    %4 = vector.broadcast %cst_2 : f32 to vector<16x1xf32>
    %5 = arith.divf %3, %4 : vector<16x1xf32>
    %6 = vector.broadcast %5 : vector<16x1xf32> to vector<16x32xf32>
    %7 = arith.subf %1, %6 : vector<16x32xf32>
    %8 = arith.mulf %7, %7 : vector<16x32xf32>
    %cst_3 = arith.constant dense<0.000000e+00> : vector<16xf32>
    %9 = vector.multi_reduction <add>, %8, %cst_3 [1] : vector<16x32xf32> to vector<16xf32>
    %10 = vector.shape_cast %9 : vector<16xf32> to vector<16x1xf32>
    %cst_4 = arith.constant 3.200000e+01 : f32
    %11 = vector.broadcast %cst_4 : f32 to vector<16x1xf32>
    %12 = arith.divf %10, %11 : vector<16x1xf32>
    %cst_5 = arith.constant 9.99999974E-6 : f32
    %13 = vector.broadcast %cst_5 : f32 to vector<16x1xf32>
    %14 = arith.addf %12, %13 : vector<16x1xf32>
    %15 = math.rsqrt %14 : vector<16x1xf32>
    %16 = vector.broadcast %15 : vector<16x1xf32> to vector<16x32xf32>
    %17 = arith.mulf %7, %16 : vector<16x32xf32>
    %c0_6 = arith.constant 0 : index
    %c0_7 = arith.constant 0 : index
    %18 = vector.load %arg3[%c0_6, %c0_7] : memref<1x32xf32, #tpu.memory_space<vmem>>, vector<1x32xf32>
    %19 = vector.broadcast %18 : vector<1x32xf32> to vector<16x32xf32>
    %20 = arith.mulf %17, %19 : vector<16x32xf32>
    %c0_8 = arith.constant 0 : index
    %c0_9 = arith.constant 0 : index
    %21 = vector.load %arg4[%c0_8, %c0_9] : memref<1x32xf32, #tpu.memory_space<vmem>>, vector<1x32xf32>
    %22 = vector.broadcast %21 : vector<1x32xf32> to vector<16x32xf32>
    %23 = arith.addf %20, %22 : vector<16x32xf32>
    %24 = arith.truncf %23 : vector<16x32xf32> to vector<16x32xbf16>
    %c0_10 = arith.constant 0 : index
    %c0_11 = arith.constant 0 : index
    %25 = vector.load %arg5[%c0_10, %c0_11] : memref<32x128xbf16, #tpu.memory_space<vmem>>, vector<32x128xbf16>
    %cst_12 = arith.constant dense<0.000000e+00> : vector<16x128xf32>
    %26 = tpu.matmul %24, %25, %cst_12 {dimension_numbers = #tpu.dot_dimension_numbers<[1], [0], [0], [1], [0, 0, 1, 1], [], []>} : vector<16x32xbf16>, vector<32x128xbf16>, vector<16x128xf32> -> vector<16x128xf32>
    %27 = vector.extract_strided_slice %26 {offsets = [0, 0], sizes = [16, 64], strides = [1, 1]} : vector<16x128xf32> to vector<16x64xf32>
    %28 = vector.extract_strided_slice %26 {offsets = [0, 64], sizes = [16, 64], strides = [1, 1]} : vector<16x128xf32> to vector<16x64xf32>
    %c0_13 = arith.constant 0 : index
    %c0_14 = arith.constant 0 : index
    %29 = vector.load %arg17[%c0_13, %c0_14] : memref<16x64xf32, #tpu.memory_space<vmem>>, vector<16x64xf32>
    tpu.vector_store %arg17[%c0_13, %c0_14], %28 {strides = array<i32>} : memref<16x64xf32, #tpu.memory_space<vmem>>, vector<16x64xf32>,
    %c0_i32 = arith.constant 0 : i32
    %30 = arith.cmpi eq, %arg1, %c0_i32 : i32
    %31 = arith.extui %30 : i1 to i32
    %c0_i32_15 = arith.constant 0 : i32
    %32 = arith.cmpi ne, %31, %c0_i32_15 : i32
    scf.if %32 {
      %cst_98 = arith.constant 0.000000e+00 : f32
      %186 = vector.broadcast %cst_98 : f32 to vector<3x64xf32>
      %c0_99 = arith.constant 0 : index
      %c0_100 = arith.constant 0 : index
      %187 = vector.load %arg14[%c0_99, %c0_100] : memref<3x64xf32, #tpu.memory_space<vmem>>, vector<3x64xf32>
      tpu.vector_store %arg14[%c0_99, %c0_100], %186 {strides = array<i32>} : memref<3x64xf32, #tpu.memory_space<vmem>>, vector<3x64xf32>,
    } else {
    }
    %c0_16 = arith.constant 0 : index
    %c0_17 = arith.constant 0 : index
    %33 = vector.load %arg14[%c0_16, %c0_17] : memref<3x64xf32, #tpu.memory_space<vmem>>, vector<3x64xf32>
    %c0_18 = arith.constant 0 : index
    %c0_19 = arith.constant 0 : index
    %34 = vector.load %arg15[%c0_18, %c0_19] : memref<19x64xf32, #tpu.memory_space<vmem>>, vector<3x64xf32>
    tpu.vector_store %arg15[%c0_18, %c0_19], %33 {strides = array<i32>} : memref<19x64xf32, #tpu.memory_space<vmem>>, vector<3x64xf32>,
    %c3 = arith.constant 3 : index
    %c0_20 = arith.constant 0 : index
    %35 = vector.load %arg15[%c3, %c0_20] : memref<19x64xf32, #tpu.memory_space<vmem>>, vector<16x64xf32>
    tpu.vector_store %arg15[%c3, %c0_20], %27 {strides = array<i32>} : memref<19x64xf32, #tpu.memory_space<vmem>>, vector<16x64xf32>,
    %36 = vector.extract_strided_slice %27 {offsets = [13, 0], sizes = [3, 64], strides = [1, 1]} : vector<16x64xf32> to vector<3x64xf32>
    %c0_21 = arith.constant 0 : index
    %c0_22 = arith.constant 0 : index
    %37 = vector.load %arg14[%c0_21, %c0_22] : memref<3x64xf32, #tpu.memory_space<vmem>>, vector<3x64xf32>
    tpu.vector_store %arg14[%c0_21, %c0_22], %36 {strides = array<i32>} : memref<3x64xf32, #tpu.memory_space<vmem>>, vector<3x64xf32>,
    %c0_23 = arith.constant 0 : index
    %c0_24 = arith.constant 0 : index
    %38 = vector.load %arg15[%c0_23, %c0_24] : memref<19x64xf32, #tpu.memory_space<vmem>>, vector<19x64xf32>
    %cst_25 = arith.constant 0.000000e+00 : f32
    %39 = vector.broadcast %cst_25 : f32 to vector<16x64xf32>
    %c0_26 = arith.constant 0 : index
    %c0_27 = arith.constant 0 : index
    %40 = vector.load %arg7[%c0_26, %c0_27] : memref<1x64xf32, #tpu.memory_space<vmem>>, vector<1x64xf32>
    %41 = vector.broadcast %40 : vector<1x64xf32> to vector<16x64xf32>
    %42 = arith.addf %39, %41 : vector<16x64xf32>
    %43 = vector.extract_strided_slice %38 {offsets = [0, 0], sizes = [16, 64], strides = [1, 1]} : vector<19x64xf32> to vector<16x64xf32>
    %c0_28 = arith.constant 0 : index
    %c0_29 = arith.constant 0 : index
    %44 = vector.load %arg6[%c0_28, %c0_29] : memref<4x64xf32, #tpu.memory_space<vmem>>, vector<1x64xf32>
    %45 = vector.broadcast %44 : vector<1x64xf32> to vector<16x64xf32>
    %46 = arith.mulf %43, %45 : vector<16x64xf32>
    %47 = arith.addf %42, %46 : vector<16x64xf32>
    %48 = vector.extract_strided_slice %38 {offsets = [1, 0], sizes = [16, 64], strides = [1, 1]} : vector<19x64xf32> to vector<16x64xf32>
    %c1 = arith.constant 1 : index
    %c0_30 = arith.constant 0 : index
    %49 = vector.load %arg6[%c1, %c0_30] : memref<4x64xf32, #tpu.memory_space<vmem>>, vector<1x64xf32>
    %50 = vector.broadcast %49 : vector<1x64xf32> to vector<16x64xf32>
    %51 = arith.mulf %48, %50 : vector<16x64xf32>
    %52 = arith.addf %47, %51 : vector<16x64xf32>
    %53 = vector.extract_strided_slice %38 {offsets = [2, 0], sizes = [16, 64], strides = [1, 1]} : vector<19x64xf32> to vector<16x64xf32>
    %c2 = arith.constant 2 : index
    %c0_31 = arith.constant 0 : index
    %54 = vector.load %arg6[%c2, %c0_31] : memref<4x64xf32, #tpu.memory_space<vmem>>, vector<1x64xf32>
    %55 = vector.broadcast %54 : vector<1x64xf32> to vector<16x64xf32>
    %56 = arith.mulf %53, %55 : vector<16x64xf32>
    %57 = arith.addf %52, %56 : vector<16x64xf32>
    %58 = vector.extract_strided_slice %38 {offsets = [3, 0], sizes = [16, 64], strides = [1, 1]} : vector<19x64xf32> to vector<16x64xf32>
    %c3_32 = arith.constant 3 : index
    %c0_33 = arith.constant 0 : index
    %59 = vector.load %arg6[%c3_32, %c0_33] : memref<4x64xf32, #tpu.memory_space<vmem>>, vector<1x64xf32>
    %60 = vector.broadcast %59 : vector<1x64xf32> to vector<16x64xf32>
    %61 = arith.mulf %58, %60 : vector<16x64xf32>
    %62 = arith.addf %57, %61 : vector<16x64xf32>
    %cst_34 = arith.constant 0.000000e+00 : f32
    %63 = vector.broadcast %cst_34 : f32 to vector<16x64xf32>
    %64 = arith.subf %63, %62 : vector<16x64xf32>
    %65 = math.exp %64 : vector<16x64xf32>
    %cst_35 = arith.constant 1.000000e+00 : f32
    %66 = vector.broadcast %cst_35 : f32 to vector<16x64xf32>
    %67 = arith.addf %66, %65 : vector<16x64xf32>
    %cst_36 = arith.constant 1.000000e+00 : f32
    %68 = vector.broadcast %cst_36 : f32 to vector<16x64xf32>
    %69 = arith.divf %68, %67 : vector<16x64xf32>
    %70 = arith.mulf %62, %69 : vector<16x64xf32>
    %c0_37 = arith.constant 0 : index
    %c0_38 = arith.constant 0 : index
    %71 = vector.load %arg16[%c0_37, %c0_38] : memref<16x64xf32, #tpu.memory_space<vmem>>, vector<16x64xf32>
    tpu.vector_store %arg16[%c0_37, %c0_38], %70 {strides = array<i32>} : memref<16x64xf32, #tpu.memory_space<vmem>>, vector<16x64xf32>,
    %72 = arith.truncf %70 : vector<16x64xf32> to vector<16x64xbf16>
    %c0_39 = arith.constant 0 : index
    %c0_40 = arith.constant 0 : index
    %73 = vector.load %arg8[%c0_39, %c0_40] : memref<64x96xbf16, #tpu.memory_space<vmem>>, vector<64x96xbf16>
    %cst_41 = arith.constant dense<0.000000e+00> : vector<16x96xf32>
    %74 = tpu.matmul %72, %73, %cst_41 {dimension_numbers = #tpu.dot_dimension_numbers<[1], [0], [0], [1], [0, 0, 1, 1], [], []>} : vector<16x64xbf16>, vector<64x96xbf16>, vector<16x96xf32> -> vector<16x96xf32>
    %75 = vector.extract_strided_slice %74 {offsets = [0, 0], sizes = [16, 64], strides = [1, 1]} : vector<16x96xf32> to vector<16x64xf32>
    %c0_42 = arith.constant 0 : index
    %c0_43 = arith.constant 0 : index
    %76 = vector.load %arg9[%c0_42, %c0_43] : memref<1x64xf32, #tpu.memory_space<vmem>>, vector<1x64xf32>
    %77 = vector.broadcast %76 : vector<1x64xf32> to vector<16x64xf32>
    %78 = arith.addf %75, %77 : vector<16x64xf32>
    %cst_44 = arith.constant 2.000000e+01 : f32
    %79 = vector.broadcast %cst_44 : f32 to vector<16x64xf32>
    %80 = arith.cmpf ogt, %78, %79 : vector<16x64xf32>
    %cst_45 = arith.constant 2.000000e+01 : f32
    %81 = vector.broadcast %cst_45 : f32 to vector<16x64xf32>
    %82 = arith.minimumf %78, %81 : vector<16x64xf32>
    %83 = math.exp %82 : vector<16x64xf32>
    %cst_46 = arith.constant 1.000000e+00 : f32
    %84 = vector.broadcast %cst_46 : f32 to vector<16x64xf32>
    %85 = arith.addf %84, %83 : vector<16x64xf32>
    %86 = math.log %85 : vector<16x64xf32>
    %87 = arith.select %80, %78, %86 : vector<16x64xi1>, vector<16x64xf32>
    %c0_47 = arith.constant 0 : index
    %c0_48 = arith.constant 0 : index
    %88 = vector.load %arg18[%c0_47, %c0_48] : memref<16x64xf32, #tpu.memory_space<vmem>>, vector<16x64xf32>
    tpu.vector_store %arg18[%c0_47, %c0_48], %87 {strides = array<i32>} : memref<16x64xf32, #tpu.memory_space<vmem>>, vector<16x64xf32>,
    %89 = vector.extract_strided_slice %74 {offsets = [0, 64], sizes = [16, 16], strides = [1, 1]} : vector<16x96xf32> to vector<16x16xf32>
    %c0_49 = arith.constant 0 : index
    %c0_50 = arith.constant 0 : index
    %90 = vector.load %arg19[%c0_49, %c0_50] : memref<16x16xf32, #tpu.memory_space<vmem>>, vector<16x16xf32>
    tpu.vector_store %arg19[%c0_49, %c0_50], %89 {strides = array<i32>} : memref<16x16xf32, #tpu.memory_space<vmem>>, vector<16x16xf32>,
    %91 = vector.extract_strided_slice %74 {offsets = [0, 80], sizes = [16, 16], strides = [1, 1]} : vector<16x96xf32> to vector<16x16xf32>
    %c0_51 = arith.constant 0 : index
    %c0_52 = arith.constant 0 : index
    %92 = vector.load %arg20[%c0_51, %c0_52] : memref<16x16xf32, #tpu.memory_space<vmem>>, vector<16x16xf32>
    tpu.vector_store %arg20[%c0_51, %c0_52], %91 {strides = array<i32>} : memref<16x16xf32, #tpu.memory_space<vmem>>, vector<16x16xf32>,
    %c0_i32_53 = arith.constant 0 : i32
    %93 = arith.cmpi eq, %arg1, %c0_i32_53 : i32
    %94 = arith.extui %93 : i1 to i32
    %c0_i32_54 = arith.constant 0 : i32
    %95 = arith.cmpi ne, %94, %c0_i32_54 : i32
    scf.if %95 {
      %cst_98 = arith.constant 0.000000e+00 : f32
      %186 = vector.broadcast %cst_98 : f32 to vector<16x64xf32>
      %c0_99 = arith.constant 0 : index
      %c0_100 = arith.constant 0 : index
      %187 = vector.load %arg22[%c0_99, %c0_100] : memref<16x64xf32, #tpu.memory_space<vmem>>, vector<16x64xf32>
      tpu.vector_store %arg22[%c0_99, %c0_100], %186 {strides = array<i32>} : memref<16x64xf32, #tpu.memory_space<vmem>>, vector<16x64xf32>,
    } else {
    }
    %c0_55 = arith.constant 0 : index
    %c0_56 = arith.constant 0 : index
    %96 = vector.load %arg10[%c0_55, %c0_56] : memref<16x1xf32, #tpu.memory_space<vmem>>, vector<16x1xf32>
    %c0_57 = arith.constant 0 : index
    %c0_58 = arith.constant 0 : index
    %97 = vector.load %arg18[%c0_57, %c0_58] : memref<16x64xf32, #tpu.memory_space<vmem>>, vector<8x64xf32>
    %98 = vector.extract_strided_slice %97 {offsets = [0, 0], sizes = [1, 64], strides = [1, 1]} : vector<8x64xf32> to vector<1x64xf32>
    %99 = vector.broadcast %96 : vector<16x1xf32> to vector<16x64xf32>
    %100 = vector.broadcast %98 : vector<1x64xf32> to vector<16x64xf32>
    %101 = arith.mulf %99, %100 : vector<16x64xf32>
    %102 = math.exp %101 : vector<16x64xf32>
    %c0_59 = arith.constant 0 : index
    %c0_60 = arith.constant 0 : index
    %c0_61 = arith.constant 0 : index
    %103 = vector.load %arg21[%c0_59, %c0_60, %c0_61] : memref<16x16x64xf32, #tpu.memory_space<vmem>>, vector<1x16x64xf32>
    %104 = vector.shape_cast %103 : vector<1x16x64xf32> to vector<16x64xf32>
    %105 = vector.shape_cast %102 : vector<16x64xf32> to vector<1x16x64xf32>
    tpu.vector_store %arg21[%c0_59, %c0_60, %c0_61], %105 {strides = array<i32>} : memref<16x16x64xf32, #tpu.memory_space<vmem>>, vector<1x16x64xf32>,
    %106 = vector.extract_strided_slice %97 {offsets = [1, 0], sizes = [1, 64], strides = [1, 1]} : vector<8x64xf32> to vector<1x64xf32>
    %107 = vector.broadcast %96 : vector<16x1xf32> to vector<16x64xf32>
    %108 = vector.broadcast %106 : vector<1x64xf32> to vector<16x64xf32>
    %109 = arith.mulf %107, %108 : vector<16x64xf32>
    %110 = math.exp %109 : vector<16x64xf32>
    %c1_62 = arith.constant 1 : index
    %c0_63 = arith.constant 0 : index
    %c0_64 = arith.constant 0 : index
    %111 = vector.load %arg21[%c1_62, %c0_63, %c0_64] : memref<16x16x64xf32, #tpu.memory_space<vmem>>, vector<1x16x64xf32>
    %112 = vector.shape_cast %111 : vector<1x16x64xf32> to vector<16x64xf32>
    %113 = vector.shape_cast %110 : vector<16x64xf32> to vector<1x16x64xf32>
    tpu.vector_store %arg21[%c1_62, %c0_63, %c0_64], %113 {strides = array<i32>} : memref<16x16x64xf32, #tpu.memory_space<vmem>>, vector<1x16x64xf32>,
    %114 = vector.extract_strided_slice %97 {offsets = [2, 0], sizes = [1, 64], strides = [1, 1]} : vector<8x64xf32> to vector<1x64xf32>
    %115 = vector.broadcast %96 : vector<16x1xf32> to vector<16x64xf32>
    %116 = vector.broadcast %114 : vector<1x64xf32> to vector<16x64xf32>
    %117 = arith.mulf %115, %116 : vector<16x64xf32>
    %118 = math.exp %117 : vector<16x64xf32>
    %c2_65 = arith.constant 2 : index
    %c0_66 = arith.constant 0 : index
    %c0_67 = arith.constant 0 : index
    %119 = vector.load %arg21[%c2_65, %c0_66, %c0_67] : memref<16x16x64xf32, #tpu.memory_space<vmem>>, vector<1x16x64xf32>
    %120 = vector.shape_cast %119 : vector<1x16x64xf32> to vector<16x64xf32>
    %121 = vector.shape_cast %118 : vector<16x64xf32> to vector<1x16x64xf32>
    tpu.vector_store %arg21[%c2_65, %c0_66, %c0_67], %121 {strides = array<i32>} : memref<16x16x64xf32, #tpu.memory_space<vmem>>, vector<1x16x64xf32>,
    %122 = vector.extract_strided_slice %97 {offsets = [3, 0], sizes = [1, 64], strides = [1, 1]} : vector<8x64xf32> to vector<1x64xf32>
    %123 = vector.broadcast %96 : vector<16x1xf32> to vector<16x64xf32>
    %124 = vector.broadcast %122 : vector<1x64xf32> to vector<16x64xf32>
    %125 = arith.mulf %123, %124 : vector<16x64xf32>
    %126 = math.exp %125 : vector<16x64xf32>
    %c3_68 = arith.constant 3 : index
    %c0_69 = arith.constant 0 : index
    %c0_70 = arith.constant 0 : index
    %127 = vector.load %arg21[%c3_68, %c0_69, %c0_70] : memref<16x16x64xf32, #tpu.memory_space<vmem>>, vector<1x16x64xf32>
    %128 = vector.shape_cast %127 : vector<1x16x64xf32> to vector<16x64xf32>
    %129 = vector.shape_cast %126 : vector<16x64xf32> to vector<1x16x64xf32>
    tpu.vector_store %arg21[%c3_68, %c0_69, %c0_70], %129 {strides = array<i32>} : memref<16x16x64xf32, #tpu.memory_space<vmem>>, vector<1x16x64xf32>,
    %130 = vector.extract_strided_slice %97 {offsets = [4, 0], sizes = [1, 64], strides = [1, 1]} : vector<8x64xf32> to vector<1x64xf32>
    %131 = vector.broadcast %96 : vector<16x1xf32> to vector<16x64xf32>
    %132 = vector.broadcast %130 : vector<1x64xf32> to vector<16x64xf32>
    %133 = arith.mulf %131, %132 : vector<16x64xf32>
    %134 = math.exp %133 : vector<16x64xf32>
    %c4 = arith.constant 4 : index
    %c0_71 = arith.constant 0 : index
    %c0_72 = arith.constant 0 : index
    %135 = vector.load %arg21[%c4, %c0_71, %c0_72] : memref<16x16x64xf32, #tpu.memory_space<vmem>>, vector<1x16x64xf32>
    %136 = vector.shape_cast %135 : vector<1x16x64xf32> to vector<16x64xf32>
    %137 = vector.shape_cast %134 : vector<16x64xf32> to vector<1x16x64xf32>
    tpu.vector_store %arg21[%c4, %c0_71, %c0_72], %137 {strides = array<i32>} : memref<16x16x64xf32, #tpu.memory_space<vmem>>, vector<1x16x64xf32>,
    %138 = vector.extract_strided_slice %97 {offsets = [5, 0], sizes = [1, 64], strides = [1, 1]} : vector<8x64xf32> to vector<1x64xf32>
    %139 = vector.broadcast %96 : vector<16x1xf32> to vector<16x64xf32>
    %140 = vector.broadcast %138 : vector<1x64xf32> to vector<16x64xf32>
    %141 = arith.mulf %139, %140 : vector<16x64xf32>
    %142 = math.exp %141 : vector<16x64xf32>
    %c5 = arith.constant 5 : index
    %c0_73 = arith.constant 0 : index
    %c0_74 = arith.constant 0 : index
    %143 = vector.load %arg21[%c5, %c0_73, %c0_74] : memref<16x16x64xf32, #tpu.memory_space<vmem>>, vector<1x16x64xf32>
    %144 = vector.shape_cast %143 : vector<1x16x64xf32> to vector<16x64xf32>
    %145 = vector.shape_cast %142 : vector<16x64xf32> to vector<1x16x64xf32>
    tpu.vector_store %arg21[%c5, %c0_73, %c0_74], %145 {strides = array<i32>} : memref<16x16x64xf32, #tpu.memory_space<vmem>>, vector<1x16x64xf32>,
    %146 = vector.extract_strided_slice %97 {offsets = [6, 0], sizes = [1, 64], strides = [1, 1]} : vector<8x64xf32> to vector<1x64xf32>
    %147 = vector.broadcast %96 : vector<16x1xf32> to vector<16x64xf32>
    %148 = vector.broadcast %146 : vector<1x64xf32> to vector<16x64xf32>
    %149 = arith.mulf %147, %148 : vector<16x64xf32>
    %150 = math.exp %149 : vector<16x64xf32>
    %c6 = arith.constant 6 : index
    %c0_75 = arith.constant 0 : index
    %c0_76 = arith.constant 0 : index
    %151 = vector.load %arg21[%c6, %c0_75, %c0_76] : memref<16x16x64xf32, #tpu.memory_space<vmem>>, vector<1x16x64xf32>
    %152 = vector.shape_cast %151 : vector<1x16x64xf32> to vector<16x64xf32>
    %153 = vector.shape_cast %150 : vector<16x64xf32> to vector<1x16x64xf32>
    tpu.vector_store %arg21[%c6, %c0_75, %c0_76], %153 {strides = array<i32>} : memref<16x16x64xf32, #tpu.memory_space<vmem>>, vector<1x16x64xf32>,
    %154 = vector.extract_strided_slice %97 {offsets = [7, 0], sizes = [1, 64], strides = [1, 1]} : vector<8x64xf32> to vector<1x64xf32>
    %155 = vector.broadcast %96 : vector<16x1xf32> to vector<16x64xf32>
    %156 = vector.broadcast %154 : vector<1x64xf32> to vector<16x64xf32>
    %157 = arith.mulf %155, %156 : vector<16x64xf32>
    %158 = math.exp %157 : vector<16x64xf32>
    %c7 = arith.constant 7 : index
    %c0_77 = arith.constant 0 : index
    %c0_78 = arith.constant 0 : index
    %159 = vector.load %arg21[%c7, %c0_77, %c0_78] : memref<16x16x64xf32, #tpu.memory_space<vmem>>, vector<1x16x64xf32>
    %160 = vector.shape_cast %159 : vector<1x16x64xf32> to vector<16x64xf32>
    %161 = vector.shape_cast %158 : vector<16x64xf32> to vector<1x16x64xf32>
    tpu.vector_store %arg21[%c7, %c0_77, %c0_78], %161 {strides = array<i32>} : memref<16x16x64xf32, #tpu.memory_space<vmem>>, vector<1x16x64xf32>,
    %c0_i32_79 = arith.constant 0 : i32
    %c2_i32 = arith.constant 2 : i32
    %162 = arith.addi %c0_i32_79, %c2_i32 : i32
    %c1_i32 = arith.constant 1 : i32
    scf.for %arg24 = %c0_i32_79 to %162 step %c1_i32  : i32 {
      %c8_i32 = arith.constant 8 : i32
      %186 = arith.muli %arg24, %c8_i32 : i32
      %187 = tpu.assume_multiple %186, 8 : i32
      %c2_i32_98 = arith.constant 2 : i32
      %c0_i32_99 = arith.constant 0 : i32
      %188 = arith.cmpi eq, %c2_i32_98, %c0_i32_99 : i32
      %c1_i32_100 = arith.constant 1 : i32
      %189 = arith.select %188, %c1_i32_100, %c2_i32_98 : i32
      %190 = arith.remsi %arg24, %189 : i32
      %c0_i32_101 = arith.constant 0 : i32
      %191 = arith.cmpi ne, %190, %c0_i32_101 : i32
      %c0_i32_102 = arith.constant 0 : i32
      %192 = arith.cmpi slt, %190, %c0_i32_102 : i32
      %c0_i32_103 = arith.constant 0 : i32
      %193 = arith.cmpi slt, %189, %c0_i32_103 : i32
      %194 = arith.xori %192, %193 : i1
      %195 = arith.andi %194, %191 : i1
      %196 = arith.addi %190, %189 : i32
      %197 = arith.select %195, %196, %190 : i32
      %c1_i32_104 = arith.constant 1 : i32
      %198 = arith.addi %arg24, %c1_i32_104 : i32
      %c2_i32_105 = arith.constant 2 : i32
      %199 = arith.cmpi slt, %198, %c2_i32_105 : i32
      %200 = arith.extui %199 : i1 to i32
      %c0_i32_106 = arith.constant 0 : i32
      %201 = arith.cmpi ne, %200, %c0_i32_106 : i32
      scf.if %201 {
        %c1_i32_166 = arith.constant 1 : i32
        %375 = arith.addi %arg24, %c1_i32_166 : i32
        %c1_i32_167 = arith.constant 1 : i32
        %376 = arith.subi %c1_i32_167, %197 : i32
        %c8_i32_168 = arith.constant 8 : i32
        %377 = arith.muli %375, %c8_i32_168 : i32
        %378 = arith.index_cast %377 : i32 to index
        %c0_169 = arith.constant 0 : index
        %379 = vector.load %arg18[%378, %c0_169] : memref<16x64xf32, #tpu.memory_space<vmem>>, vector<8x64xf32>
        %380 = vector.extract_strided_slice %379 {offsets = [0, 0], sizes = [1, 64], strides = [1, 1]} : vector<8x64xf32> to vector<1x64xf32>
        %381 = vector.broadcast %96 : vector<16x1xf32> to vector<16x64xf32>
        %382 = vector.broadcast %380 : vector<1x64xf32> to vector<16x64xf32>
        %383 = arith.mulf %381, %382 : vector<16x64xf32>
        %384 = math.exp %383 : vector<16x64xf32>
        %c8_i32_170 = arith.constant 8 : i32
        %385 = arith.muli %376, %c8_i32_170 : i32
        %c0_i32_171 = arith.constant 0 : i32
        %386 = arith.addi %385, %c0_i32_171 : i32
        %387 = arith.index_cast %386 : i32 to index
        %c0_172 = arith.constant 0 : index
        %c0_173 = arith.constant 0 : index
        %388 = vector.load %arg21[%387, %c0_172, %c0_173] : memref<16x16x64xf32, #tpu.memory_space<vmem>>, vector<1x16x64xf32>
        %389 = vector.shape_cast %388 : vector<1x16x64xf32> to vector<16x64xf32>
        %390 = vector.shape_cast %384 : vector<16x64xf32> to vector<1x16x64xf32>
        tpu.vector_store %arg21[%387, %c0_172, %c0_173], %390 {strides = array<i32>} : memref<16x16x64xf32, #tpu.memory_space<vmem>>, vector<1x16x64xf32>,
        %391 = vector.extract_strided_slice %379 {offsets = [1, 0], sizes = [1, 64], strides = [1, 1]} : vector<8x64xf32> to vector<1x64xf32>
        %392 = vector.broadcast %96 : vector<16x1xf32> to vector<16x64xf32>
        %393 = vector.broadcast %391 : vector<1x64xf32> to vector<16x64xf32>
        %394 = arith.mulf %392, %393 : vector<16x64xf32>
        %395 = math.exp %394 : vector<16x64xf32>
        %c8_i32_174 = arith.constant 8 : i32
        %396 = arith.muli %376, %c8_i32_174 : i32
        %c1_i32_175 = arith.constant 1 : i32
        %397 = arith.addi %396, %c1_i32_175 : i32
        %398 = arith.index_cast %397 : i32 to index
        %c0_176 = arith.constant 0 : index
        %c0_177 = arith.constant 0 : index
        %399 = vector.load %arg21[%398, %c0_176, %c0_177] : memref<16x16x64xf32, #tpu.memory_space<vmem>>, vector<1x16x64xf32>
        %400 = vector.shape_cast %399 : vector<1x16x64xf32> to vector<16x64xf32>
        %401 = vector.shape_cast %395 : vector<16x64xf32> to vector<1x16x64xf32>
        tpu.vector_store %arg21[%398, %c0_176, %c0_177], %401 {strides = array<i32>} : memref<16x16x64xf32, #tpu.memory_space<vmem>>, vector<1x16x64xf32>,
        %402 = vector.extract_strided_slice %379 {offsets = [2, 0], sizes = [1, 64], strides = [1, 1]} : vector<8x64xf32> to vector<1x64xf32>
        %403 = vector.broadcast %96 : vector<16x1xf32> to vector<16x64xf32>
        %404 = vector.broadcast %402 : vector<1x64xf32> to vector<16x64xf32>
        %405 = arith.mulf %403, %404 : vector<16x64xf32>
        %406 = math.exp %405 : vector<16x64xf32>
        %c8_i32_178 = arith.constant 8 : i32
        %407 = arith.muli %376, %c8_i32_178 : i32
        %c2_i32_179 = arith.constant 2 : i32
        %408 = arith.addi %407, %c2_i32_179 : i32
        %409 = arith.index_cast %408 : i32 to index
        %c0_180 = arith.constant 0 : index
        %c0_181 = arith.constant 0 : index
        %410 = vector.load %arg21[%409, %c0_180, %c0_181] : memref<16x16x64xf32, #tpu.memory_space<vmem>>, vector<1x16x64xf32>
        %411 = vector.shape_cast %410 : vector<1x16x64xf32> to vector<16x64xf32>
        %412 = vector.shape_cast %406 : vector<16x64xf32> to vector<1x16x64xf32>
        tpu.vector_store %arg21[%409, %c0_180, %c0_181], %412 {strides = array<i32>} : memref<16x16x64xf32, #tpu.memory_space<vmem>>, vector<1x16x64xf32>,
        %413 = vector.extract_strided_slice %379 {offsets = [3, 0], sizes = [1, 64], strides = [1, 1]} : vector<8x64xf32> to vector<1x64xf32>
        %414 = vector.broadcast %96 : vector<16x1xf32> to vector<16x64xf32>
        %415 = vector.broadcast %413 : vector<1x64xf32> to vector<16x64xf32>
        %416 = arith.mulf %414, %415 : vector<16x64xf32>
        %417 = math.exp %416 : vector<16x64xf32>
        %c8_i32_182 = arith.constant 8 : i32
        %418 = arith.muli %376, %c8_i32_182 : i32
        %c3_i32_183 = arith.constant 3 : i32
        %419 = arith.addi %418, %c3_i32_183 : i32
        %420 = arith.index_cast %419 : i32 to index
        %c0_184 = arith.constant 0 : index
        %c0_185 = arith.constant 0 : index
        %421 = vector.load %arg21[%420, %c0_184, %c0_185] : memref<16x16x64xf32, #tpu.memory_space<vmem>>, vector<1x16x64xf32>
        %422 = vector.shape_cast %421 : vector<1x16x64xf32> to vector<16x64xf32>
        %423 = vector.shape_cast %417 : vector<16x64xf32> to vector<1x16x64xf32>
        tpu.vector_store %arg21[%420, %c0_184, %c0_185], %423 {strides = array<i32>} : memref<16x16x64xf32, #tpu.memory_space<vmem>>, vector<1x16x64xf32>,
        %424 = vector.extract_strided_slice %379 {offsets = [4, 0], sizes = [1, 64], strides = [1, 1]} : vector<8x64xf32> to vector<1x64xf32>
        %425 = vector.broadcast %96 : vector<16x1xf32> to vector<16x64xf32>
        %426 = vector.broadcast %424 : vector<1x64xf32> to vector<16x64xf32>
        %427 = arith.mulf %425, %426 : vector<16x64xf32>
        %428 = math.exp %427 : vector<16x64xf32>
        %c8_i32_186 = arith.constant 8 : i32
        %429 = arith.muli %376, %c8_i32_186 : i32
        %c4_i32_187 = arith.constant 4 : i32
        %430 = arith.addi %429, %c4_i32_187 : i32
        %431 = arith.index_cast %430 : i32 to index
        %c0_188 = arith.constant 0 : index
        %c0_189 = arith.constant 0 : index
        %432 = vector.load %arg21[%431, %c0_188, %c0_189] : memref<16x16x64xf32, #tpu.memory_space<vmem>>, vector<1x16x64xf32>
        %433 = vector.shape_cast %432 : vector<1x16x64xf32> to vector<16x64xf32>
        %434 = vector.shape_cast %428 : vector<16x64xf32> to vector<1x16x64xf32>
        tpu.vector_store %arg21[%431, %c0_188, %c0_189], %434 {strides = array<i32>} : memref<16x16x64xf32, #tpu.memory_space<vmem>>, vector<1x16x64xf32>,
        %435 = vector.extract_strided_slice %379 {offsets = [5, 0], sizes = [1, 64], strides = [1, 1]} : vector<8x64xf32> to vector<1x64xf32>
        %436 = vector.broadcast %96 : vector<16x1xf32> to vector<16x64xf32>
        %437 = vector.broadcast %435 : vector<1x64xf32> to vector<16x64xf32>
        %438 = arith.mulf %436, %437 : vector<16x64xf32>
        %439 = math.exp %438 : vector<16x64xf32>
        %c8_i32_190 = arith.constant 8 : i32
        %440 = arith.muli %376, %c8_i32_190 : i32
        %c5_i32_191 = arith.constant 5 : i32
        %441 = arith.addi %440, %c5_i32_191 : i32
        %442 = arith.index_cast %441 : i32 to index
        %c0_192 = arith.constant 0 : index
        %c0_193 = arith.constant 0 : index
        %443 = vector.load %arg21[%442, %c0_192, %c0_193] : memref<16x16x64xf32, #tpu.memory_space<vmem>>, vector<1x16x64xf32>
        %444 = vector.shape_cast %443 : vector<1x16x64xf32> to vector<16x64xf32>
        %445 = vector.shape_cast %439 : vector<16x64xf32> to vector<1x16x64xf32>
        tpu.vector_store %arg21[%442, %c0_192, %c0_193], %445 {strides = array<i32>} : memref<16x16x64xf32, #tpu.memory_space<vmem>>, vector<1x16x64xf32>,
        %446 = vector.extract_strided_slice %379 {offsets = [6, 0], sizes = [1, 64], strides = [1, 1]} : vector<8x64xf32> to vector<1x64xf32>
        %447 = vector.broadcast %96 : vector<16x1xf32> to vector<16x64xf32>
        %448 = vector.broadcast %446 : vector<1x64xf32> to vector<16x64xf32>
        %449 = arith.mulf %447, %448 : vector<16x64xf32>
        %450 = math.exp %449 : vector<16x64xf32>
        %c8_i32_194 = arith.constant 8 : i32
        %451 = arith.muli %376, %c8_i32_194 : i32
        %c6_i32_195 = arith.constant 6 : i32
        %452 = arith.addi %451, %c6_i32_195 : i32
        %453 = arith.index_cast %452 : i32 to index
        %c0_196 = arith.constant 0 : index
        %c0_197 = arith.constant 0 : index
        %454 = vector.load %arg21[%453, %c0_196, %c0_197] : memref<16x16x64xf32, #tpu.memory_space<vmem>>, vector<1x16x64xf32>
        %455 = vector.shape_cast %454 : vector<1x16x64xf32> to vector<16x64xf32>
        %456 = vector.shape_cast %450 : vector<16x64xf32> to vector<1x16x64xf32>
        tpu.vector_store %arg21[%453, %c0_196, %c0_197], %456 {strides = array<i32>} : memref<16x16x64xf32, #tpu.memory_space<vmem>>, vector<1x16x64xf32>,
        %457 = vector.extract_strided_slice %379 {offsets = [7, 0], sizes = [1, 64], strides = [1, 1]} : vector<8x64xf32> to vector<1x64xf32>
        %458 = vector.broadcast %96 : vector<16x1xf32> to vector<16x64xf32>
        %459 = vector.broadcast %457 : vector<1x64xf32> to vector<16x64xf32>
        %460 = arith.mulf %458, %459 : vector<16x64xf32>
        %461 = math.exp %460 : vector<16x64xf32>
        %c8_i32_198 = arith.constant 8 : i32
        %462 = arith.muli %376, %c8_i32_198 : i32
        %c7_i32_199 = arith.constant 7 : i32
        %463 = arith.addi %462, %c7_i32_199 : i32
        %464 = arith.index_cast %463 : i32 to index
        %c0_200 = arith.constant 0 : index
        %c0_201 = arith.constant 0 : index
        %465 = vector.load %arg21[%464, %c0_200, %c0_201] : memref<16x16x64xf32, #tpu.memory_space<vmem>>, vector<1x16x64xf32>
        %466 = vector.shape_cast %465 : vector<1x16x64xf32> to vector<16x64xf32>
        %467 = vector.shape_cast %461 : vector<16x64xf32> to vector<1x16x64xf32>
        tpu.vector_store %arg21[%464, %c0_200, %c0_201], %467 {strides = array<i32>} : memref<16x16x64xf32, #tpu.memory_space<vmem>>, vector<1x16x64xf32>,
      } else {
      }
      %202 = arith.index_cast %187 : i32 to index
      %c0_107 = arith.constant 0 : index
      %203 = vector.load %arg18[%202, %c0_107] : memref<16x64xf32, #tpu.memory_space<vmem>>, vector<8x64xf32>
      %204 = arith.index_cast %187 : i32 to index
      %c0_108 = arith.constant 0 : index
      %205 = vector.load %arg16[%204, %c0_108] : memref<16x64xf32, #tpu.memory_space<vmem>>, vector<8x64xf32>
      %206 = arith.mulf %203, %205 : vector<8x64xf32>
      %207 = arith.index_cast %187 : i32 to index
      %c0_109 = arith.constant 0 : index
      %208 = vector.load %arg19[%207, %c0_109] : memref<16x16xf32, #tpu.memory_space<vmem>>, vector<8x16xf32>
      %209 = tpu.transpose %208, [1, 0] : vector<8x16xf32> -> vector<16x8xf32>
      %210 = arith.index_cast %187 : i32 to index
      %c0_110 = arith.constant 0 : index
      %211 = vector.load %arg20[%210, %c0_110] : memref<16x16xf32, #tpu.memory_space<vmem>>, vector<8x16xf32>
      %212 = tpu.transpose %211, [1, 0] : vector<8x16xf32> -> vector<16x8xf32>
      %c0_111 = arith.constant 0 : index
      %c0_112 = arith.constant 0 : index
      %213 = vector.load %arg22[%c0_111, %c0_112] : memref<16x64xf32, #tpu.memory_space<vmem>>, vector<16x64xf32>
      %c8_i32_113 = arith.constant 8 : i32
      %214 = arith.muli %197, %c8_i32_113 : i32
      %c0_i32_114 = arith.constant 0 : i32
      %215 = arith.addi %214, %c0_i32_114 : i32
      %216 = arith.index_cast %215 : i32 to index
      %c0_115 = arith.constant 0 : index
      %c0_116 = arith.constant 0 : index
      %217 = vector.load %arg21[%216, %c0_115, %c0_116] : memref<16x16x64xf32, #tpu.memory_space<vmem>>, vector<1x16x64xf32>
      %218 = vector.shape_cast %217 : vector<1x16x64xf32> to vector<16x64xf32>
      %219 = arith.mulf %218, %213 : vector<16x64xf32>
      %220 = vector.extract_strided_slice %209 {offsets = [0, 0], sizes = [16, 1], strides = [1, 1]} : vector<16x8xf32> to vector<16x1xf32>
      %221 = vector.extract_strided_slice %206 {offsets = [0, 0], sizes = [1, 64], strides = [1, 1]} : vector<8x64xf32> to vector<1x64xf32>
      %222 = vector.broadcast %220 : vector<16x1xf32> to vector<16x64xf32>
      %223 = vector.broadcast %221 : vector<1x64xf32> to vector<16x64xf32>
      %224 = arith.mulf %222, %223 : vector<16x64xf32>
      %225 = arith.addf %219, %224 : vector<16x64xf32>
      %226 = vector.extract_strided_slice %212 {offsets = [0, 0], sizes = [16, 1], strides = [1, 1]} : vector<16x8xf32> to vector<16x1xf32>
      %227 = vector.broadcast %226 : vector<16x1xf32> to vector<16x64xf32>
      %228 = arith.mulf %227, %225 : vector<16x64xf32>
      %cst_117 = arith.constant dense<0.000000e+00> : vector<64xf32>
      %229 = vector.multi_reduction <add>, %228, %cst_117 [0] : vector<16x64xf32> to vector<64xf32>
      %230 = vector.shape_cast %229 : vector<64xf32> to vector<1x64xf32>
      %c0_i32_118 = arith.constant 0 : i32
      %231 = arith.addi %187, %c0_i32_118 : i32
      %232 = arith.index_cast %231 : i32 to index
      %c0_119 = arith.constant 0 : index
      %233 = vector.load %arg23[%232, %c0_119] : memref<16x64xf32, #tpu.memory_space<vmem>>, vector<1x64xf32>
      tpu.vector_store %arg23[%232, %c0_119], %230 {strides = array<i32>} : memref<16x64xf32, #tpu.memory_space<vmem>>, vector<1x64xf32>,
      %c8_i32_120 = arith.constant 8 : i32
      %234 = arith.muli %197, %c8_i32_120 : i32
      %c1_i32_121 = arith.constant 1 : i32
      %235 = arith.addi %234, %c1_i32_121 : i32
      %236 = arith.index_cast %235 : i32 to index
      %c0_122 = arith.constant 0 : index
      %c0_123 = arith.constant 0 : index
      %237 = vector.load %arg21[%236, %c0_122, %c0_123] : memref<16x16x64xf32, #tpu.memory_space<vmem>>, vector<1x16x64xf32>
      %238 = vector.shape_cast %237 : vector<1x16x64xf32> to vector<16x64xf32>
      %239 = arith.mulf %238, %225 : vector<16x64xf32>
      %240 = vector.extract_strided_slice %209 {offsets = [0, 1], sizes = [16, 1], strides = [1, 1]} : vector<16x8xf32> to vector<16x1xf32>
      %241 = vector.extract_strided_slice %206 {offsets = [1, 0], sizes = [1, 64], strides = [1, 1]} : vector<8x64xf32> to vector<1x64xf32>
      %242 = vector.broadcast %240 : vector<16x1xf32> to vector<16x64xf32>
      %243 = vector.broadcast %241 : vector<1x64xf32> to vector<16x64xf32>
      %244 = arith.mulf %242, %243 : vector<16x64xf32>
      %245 = arith.addf %239, %244 : vector<16x64xf32>
      %246 = vector.extract_strided_slice %212 {offsets = [0, 1], sizes = [16, 1], strides = [1, 1]} : vector<16x8xf32> to vector<16x1xf32>
      %247 = vector.broadcast %246 : vector<16x1xf32> to vector<16x64xf32>
      %248 = arith.mulf %247, %245 : vector<16x64xf32>
      %cst_124 = arith.constant dense<0.000000e+00> : vector<64xf32>
      %249 = vector.multi_reduction <add>, %248, %cst_124 [0] : vector<16x64xf32> to vector<64xf32>
      %250 = vector.shape_cast %249 : vector<64xf32> to vector<1x64xf32>
      %c1_i32_125 = arith.constant 1 : i32
      %251 = arith.addi %187, %c1_i32_125 : i32
      %252 = arith.index_cast %251 : i32 to index
      %c0_126 = arith.constant 0 : index
      %253 = vector.load %arg23[%252, %c0_126] : memref<16x64xf32, #tpu.memory_space<vmem>>, vector<1x64xf32>
      tpu.vector_store %arg23[%252, %c0_126], %250 {strides = array<i32>} : memref<16x64xf32, #tpu.memory_space<vmem>>, vector<1x64xf32>,
      %c8_i32_127 = arith.constant 8 : i32
      %254 = arith.muli %197, %c8_i32_127 : i32
      %c2_i32_128 = arith.constant 2 : i32
      %255 = arith.addi %254, %c2_i32_128 : i32
      %256 = arith.index_cast %255 : i32 to index
      %c0_129 = arith.constant 0 : index
      %c0_130 = arith.constant 0 : index
      %257 = vector.load %arg21[%256, %c0_129, %c0_130] : memref<16x16x64xf32, #tpu.memory_space<vmem>>, vector<1x16x64xf32>
      %258 = vector.shape_cast %257 : vector<1x16x64xf32> to vector<16x64xf32>
      %259 = arith.mulf %258, %245 : vector<16x64xf32>
      %260 = vector.extract_strided_slice %209 {offsets = [0, 2], sizes = [16, 1], strides = [1, 1]} : vector<16x8xf32> to vector<16x1xf32>
      %261 = vector.extract_strided_slice %206 {offsets = [2, 0], sizes = [1, 64], strides = [1, 1]} : vector<8x64xf32> to vector<1x64xf32>
      %262 = vector.broadcast %260 : vector<16x1xf32> to vector<16x64xf32>
      %263 = vector.broadcast %261 : vector<1x64xf32> to vector<16x64xf32>
      %264 = arith.mulf %262, %263 : vector<16x64xf32>
      %265 = arith.addf %259, %264 : vector<16x64xf32>
      %266 = vector.extract_strided_slice %212 {offsets = [0, 2], sizes = [16, 1], strides = [1, 1]} : vector<16x8xf32> to vector<16x1xf32>
      %267 = vector.broadcast %266 : vector<16x1xf32> to vector<16x64xf32>
      %268 = arith.mulf %267, %265 : vector<16x64xf32>
      %cst_131 = arith.constant dense<0.000000e+00> : vector<64xf32>
      %269 = vector.multi_reduction <add>, %268, %cst_131 [0] : vector<16x64xf32> to vector<64xf32>
      %270 = vector.shape_cast %269 : vector<64xf32> to vector<1x64xf32>
      %c2_i32_132 = arith.constant 2 : i32
      %271 = arith.addi %187, %c2_i32_132 : i32
      %272 = arith.index_cast %271 : i32 to index
      %c0_133 = arith.constant 0 : index
      %273 = vector.load %arg23[%272, %c0_133] : memref<16x64xf32, #tpu.memory_space<vmem>>, vector<1x64xf32>
      tpu.vector_store %arg23[%272, %c0_133], %270 {strides = array<i32>} : memref<16x64xf32, #tpu.memory_space<vmem>>, vector<1x64xf32>,
      %c8_i32_134 = arith.constant 8 : i32
      %274 = arith.muli %197, %c8_i32_134 : i32
      %c3_i32 = arith.constant 3 : i32
      %275 = arith.addi %274, %c3_i32 : i32
      %276 = arith.index_cast %275 : i32 to index
      %c0_135 = arith.constant 0 : index
      %c0_136 = arith.constant 0 : index
      %277 = vector.load %arg21[%276, %c0_135, %c0_136] : memref<16x16x64xf32, #tpu.memory_space<vmem>>, vector<1x16x64xf32>
      %278 = vector.shape_cast %277 : vector<1x16x64xf32> to vector<16x64xf32>
      %279 = arith.mulf %278, %265 : vector<16x64xf32>
      %280 = vector.extract_strided_slice %209 {offsets = [0, 3], sizes = [16, 1], strides = [1, 1]} : vector<16x8xf32> to vector<16x1xf32>
      %281 = vector.extract_strided_slice %206 {offsets = [3, 0], sizes = [1, 64], strides = [1, 1]} : vector<8x64xf32> to vector<1x64xf32>
      %282 = vector.broadcast %280 : vector<16x1xf32> to vector<16x64xf32>
      %283 = vector.broadcast %281 : vector<1x64xf32> to vector<16x64xf32>
      %284 = arith.mulf %282, %283 : vector<16x64xf32>
      %285 = arith.addf %279, %284 : vector<16x64xf32>
      %286 = vector.extract_strided_slice %212 {offsets = [0, 3], sizes = [16, 1], strides = [1, 1]} : vector<16x8xf32> to vector<16x1xf32>
      %287 = vector.broadcast %286 : vector<16x1xf32> to vector<16x64xf32>
      %288 = arith.mulf %287, %285 : vector<16x64xf32>
      %cst_137 = arith.constant dense<0.000000e+00> : vector<64xf32>
      %289 = vector.multi_reduction <add>, %288, %cst_137 [0] : vector<16x64xf32> to vector<64xf32>
      %290 = vector.shape_cast %289 : vector<64xf32> to vector<1x64xf32>
      %c3_i32_138 = arith.constant 3 : i32
      %291 = arith.addi %187, %c3_i32_138 : i32
      %292 = arith.index_cast %291 : i32 to index
      %c0_139 = arith.constant 0 : index
      %293 = vector.load %arg23[%292, %c0_139] : memref<16x64xf32, #tpu.memory_space<vmem>>, vector<1x64xf32>
      tpu.vector_store %arg23[%292, %c0_139], %290 {strides = array<i32>} : memref<16x64xf32, #tpu.memory_space<vmem>>, vector<1x64xf32>,
      %c8_i32_140 = arith.constant 8 : i32
      %294 = arith.muli %197, %c8_i32_140 : i32
      %c4_i32 = arith.constant 4 : i32
      %295 = arith.addi %294, %c4_i32 : i32
      %296 = arith.index_cast %295 : i32 to index
      %c0_141 = arith.constant 0 : index
      %c0_142 = arith.constant 0 : index
      %297 = vector.load %arg21[%296, %c0_141, %c0_142] : memref<16x16x64xf32, #tpu.memory_space<vmem>>, vector<1x16x64xf32>
      %298 = vector.shape_cast %297 : vector<1x16x64xf32> to vector<16x64xf32>
      %299 = arith.mulf %298, %285 : vector<16x64xf32>
      %300 = vector.extract_strided_slice %209 {offsets = [0, 4], sizes = [16, 1], strides = [1, 1]} : vector<16x8xf32> to vector<16x1xf32>
      %301 = vector.extract_strided_slice %206 {offsets = [4, 0], sizes = [1, 64], strides = [1, 1]} : vector<8x64xf32> to vector<1x64xf32>
      %302 = vector.broadcast %300 : vector<16x1xf32> to vector<16x64xf32>
      %303 = vector.broadcast %301 : vector<1x64xf32> to vector<16x64xf32>
      %304 = arith.mulf %302, %303 : vector<16x64xf32>
      %305 = arith.addf %299, %304 : vector<16x64xf32>
      %306 = vector.extract_strided_slice %212 {offsets = [0, 4], sizes = [16, 1], strides = [1, 1]} : vector<16x8xf32> to vector<16x1xf32>
      %307 = vector.broadcast %306 : vector<16x1xf32> to vector<16x64xf32>
      %308 = arith.mulf %307, %305 : vector<16x64xf32>
      %cst_143 = arith.constant dense<0.000000e+00> : vector<64xf32>
      %309 = vector.multi_reduction <add>, %308, %cst_143 [0] : vector<16x64xf32> to vector<64xf32>
      %310 = vector.shape_cast %309 : vector<64xf32> to vector<1x64xf32>
      %c4_i32_144 = arith.constant 4 : i32
      %311 = arith.addi %187, %c4_i32_144 : i32
      %312 = arith.index_cast %311 : i32 to index
      %c0_145 = arith.constant 0 : index
      %313 = vector.load %arg23[%312, %c0_145] : memref<16x64xf32, #tpu.memory_space<vmem>>, vector<1x64xf32>
      tpu.vector_store %arg23[%312, %c0_145], %310 {strides = array<i32>} : memref<16x64xf32, #tpu.memory_space<vmem>>, vector<1x64xf32>,
      %c8_i32_146 = arith.constant 8 : i32
      %314 = arith.muli %197, %c8_i32_146 : i32
      %c5_i32 = arith.constant 5 : i32
      %315 = arith.addi %314, %c5_i32 : i32
      %316 = arith.index_cast %315 : i32 to index
      %c0_147 = arith.constant 0 : index
      %c0_148 = arith.constant 0 : index
      %317 = vector.load %arg21[%316, %c0_147, %c0_148] : memref<16x16x64xf32, #tpu.memory_space<vmem>>, vector<1x16x64xf32>
      %318 = vector.shape_cast %317 : vector<1x16x64xf32> to vector<16x64xf32>
      %319 = arith.mulf %318, %305 : vector<16x64xf32>
      %320 = vector.extract_strided_slice %209 {offsets = [0, 5], sizes = [16, 1], strides = [1, 1]} : vector<16x8xf32> to vector<16x1xf32>
      %321 = vector.extract_strided_slice %206 {offsets = [5, 0], sizes = [1, 64], strides = [1, 1]} : vector<8x64xf32> to vector<1x64xf32>
      %322 = vector.broadcast %320 : vector<16x1xf32> to vector<16x64xf32>
      %323 = vector.broadcast %321 : vector<1x64xf32> to vector<16x64xf32>
      %324 = arith.mulf %322, %323 : vector<16x64xf32>
      %325 = arith.addf %319, %324 : vector<16x64xf32>
      %326 = vector.extract_strided_slice %212 {offsets = [0, 5], sizes = [16, 1], strides = [1, 1]} : vector<16x8xf32> to vector<16x1xf32>
      %327 = vector.broadcast %326 : vector<16x1xf32> to vector<16x64xf32>
      %328 = arith.mulf %327, %325 : vector<16x64xf32>
      %cst_149 = arith.constant dense<0.000000e+00> : vector<64xf32>
      %329 = vector.multi_reduction <add>, %328, %cst_149 [0] : vector<16x64xf32> to vector<64xf32>
      %330 = vector.shape_cast %329 : vector<64xf32> to vector<1x64xf32>
      %c5_i32_150 = arith.constant 5 : i32
      %331 = arith.addi %187, %c5_i32_150 : i32
      %332 = arith.index_cast %331 : i32 to index
      %c0_151 = arith.constant 0 : index
      %333 = vector.load %arg23[%332, %c0_151] : memref<16x64xf32, #tpu.memory_space<vmem>>, vector<1x64xf32>
      tpu.vector_store %arg23[%332, %c0_151], %330 {strides = array<i32>} : memref<16x64xf32, #tpu.memory_space<vmem>>, vector<1x64xf32>,
      %c8_i32_152 = arith.constant 8 : i32
      %334 = arith.muli %197, %c8_i32_152 : i32
      %c6_i32 = arith.constant 6 : i32
      %335 = arith.addi %334, %c6_i32 : i32
      %336 = arith.index_cast %335 : i32 to index
      %c0_153 = arith.constant 0 : index
      %c0_154 = arith.constant 0 : index
      %337 = vector.load %arg21[%336, %c0_153, %c0_154] : memref<16x16x64xf32, #tpu.memory_space<vmem>>, vector<1x16x64xf32>
      %338 = vector.shape_cast %337 : vector<1x16x64xf32> to vector<16x64xf32>
      %339 = arith.mulf %338, %325 : vector<16x64xf32>
      %340 = vector.extract_strided_slice %209 {offsets = [0, 6], sizes = [16, 1], strides = [1, 1]} : vector<16x8xf32> to vector<16x1xf32>
      %341 = vector.extract_strided_slice %206 {offsets = [6, 0], sizes = [1, 64], strides = [1, 1]} : vector<8x64xf32> to vector<1x64xf32>
      %342 = vector.broadcast %340 : vector<16x1xf32> to vector<16x64xf32>
      %343 = vector.broadcast %341 : vector<1x64xf32> to vector<16x64xf32>
      %344 = arith.mulf %342, %343 : vector<16x64xf32>
      %345 = arith.addf %339, %344 : vector<16x64xf32>
      %346 = vector.extract_strided_slice %212 {offsets = [0, 6], sizes = [16, 1], strides = [1, 1]} : vector<16x8xf32> to vector<16x1xf32>
      %347 = vector.broadcast %346 : vector<16x1xf32> to vector<16x64xf32>
      %348 = arith.mulf %347, %345 : vector<16x64xf32>
      %cst_155 = arith.constant dense<0.000000e+00> : vector<64xf32>
      %349 = vector.multi_reduction <add>, %348, %cst_155 [0] : vector<16x64xf32> to vector<64xf32>
      %350 = vector.shape_cast %349 : vector<64xf32> to vector<1x64xf32>
      %c6_i32_156 = arith.constant 6 : i32
      %351 = arith.addi %187, %c6_i32_156 : i32
      %352 = arith.index_cast %351 : i32 to index
      %c0_157 = arith.constant 0 : index
      %353 = vector.load %arg23[%352, %c0_157] : memref<16x64xf32, #tpu.memory_space<vmem>>, vector<1x64xf32>
      tpu.vector_store %arg23[%352, %c0_157], %350 {strides = array<i32>} : memref<16x64xf32, #tpu.memory_space<vmem>>, vector<1x64xf32>,
      %c8_i32_158 = arith.constant 8 : i32
      %354 = arith.muli %197, %c8_i32_158 : i32
      %c7_i32 = arith.constant 7 : i32
      %355 = arith.addi %354, %c7_i32 : i32
      %356 = arith.index_cast %355 : i32 to index
      %c0_159 = arith.constant 0 : index
      %c0_160 = arith.constant 0 : index
      %357 = vector.load %arg21[%356, %c0_159, %c0_160] : memref<16x16x64xf32, #tpu.memory_space<vmem>>, vector<1x16x64xf32>
      %358 = vector.shape_cast %357 : vector<1x16x64xf32> to vector<16x64xf32>
      %359 = arith.mulf %358, %345 : vector<16x64xf32>
      %360 = vector.extract_strided_slice %209 {offsets = [0, 7], sizes = [16, 1], strides = [1, 1]} : vector<16x8xf32> to vector<16x1xf32>
      %361 = vector.extract_strided_slice %206 {offsets = [7, 0], sizes = [1, 64], strides = [1, 1]} : vector<8x64xf32> to vector<1x64xf32>
      %362 = vector.broadcast %360 : vector<16x1xf32> to vector<16x64xf32>
      %363 = vector.broadcast %361 : vector<1x64xf32> to vector<16x64xf32>
      %364 = arith.mulf %362, %363 : vector<16x64xf32>
      %365 = arith.addf %359, %364 : vector<16x64xf32>
      %366 = vector.extract_strided_slice %212 {offsets = [0, 7], sizes = [16, 1], strides = [1, 1]} : vector<16x8xf32> to vector<16x1xf32>
      %367 = vector.broadcast %366 : vector<16x1xf32> to vector<16x64xf32>
      %368 = arith.mulf %367, %365 : vector<16x64xf32>
      %cst_161 = arith.constant dense<0.000000e+00> : vector<64xf32>
      %369 = vector.multi_reduction <add>, %368, %cst_161 [0] : vector<16x64xf32> to vector<64xf32>
      %370 = vector.shape_cast %369 : vector<64xf32> to vector<1x64xf32>
      %c7_i32_162 = arith.constant 7 : i32
      %371 = arith.addi %187, %c7_i32_162 : i32
      %372 = arith.index_cast %371 : i32 to index
      %c0_163 = arith.constant 0 : index
      %373 = vector.load %arg23[%372, %c0_163] : memref<16x64xf32, #tpu.memory_space<vmem>>, vector<1x64xf32>
      tpu.vector_store %arg23[%372, %c0_163], %370 {strides = array<i32>} : memref<16x64xf32, #tpu.memory_space<vmem>>, vector<1x64xf32>,
      %c0_164 = arith.constant 0 : index
      %c0_165 = arith.constant 0 : index
      %374 = vector.load %arg22[%c0_164, %c0_165] : memref<16x64xf32, #tpu.memory_space<vmem>>, vector<16x64xf32>
      tpu.vector_store %arg22[%c0_164, %c0_165], %365 {strides = array<i32>} : memref<16x64xf32, #tpu.memory_space<vmem>>, vector<16x64xf32>,
    }
    %c2_i32_80 = arith.constant 2 : i32
    %c0_81 = arith.constant 0 : index
    %c0_82 = arith.constant 0 : index
    %163 = vector.load %arg17[%c0_81, %c0_82] : memref<16x64xf32, #tpu.memory_space<vmem>>, vector<16x64xf32>
    %c0_83 = arith.constant 0 : index
    %c0_84 = arith.constant 0 : index
    %164 = vector.load %arg23[%c0_83, %c0_84] : memref<16x64xf32, #tpu.memory_space<vmem>>, vector<16x64xf32>
    %c0_85 = arith.constant 0 : index
    %c0_86 = arith.constant 0 : index
    %165 = vector.load %arg16[%c0_85, %c0_86] : memref<16x64xf32, #tpu.memory_space<vmem>>, vector<16x64xf32>
    %c0_87 = arith.constant 0 : index
    %c0_88 = arith.constant 0 : index
    %166 = vector.load %arg11[%c0_87, %c0_88] : memref<1x64xf32, #tpu.memory_space<vmem>>, vector<1x64xf32>
    %167 = vector.broadcast %166 : vector<1x64xf32> to vector<16x64xf32>
    %168 = arith.mulf %165, %167 : vector<16x64xf32>
    %169 = arith.addf %164, %168 : vector<16x64xf32>
    %cst_89 = arith.constant 0.000000e+00 : f32
    %170 = vector.broadcast %cst_89 : f32 to vector<16x64xf32>
    %171 = arith.subf %170, %163 : vector<16x64xf32>
    %172 = math.exp %171 : vector<16x64xf32>
    %cst_90 = arith.constant 1.000000e+00 : f32
    %173 = vector.broadcast %cst_90 : f32 to vector<16x64xf32>
    %174 = arith.addf %173, %172 : vector<16x64xf32>
    %cst_91 = arith.constant 1.000000e+00 : f32
    %175 = vector.broadcast %cst_91 : f32 to vector<16x64xf32>
    %176 = arith.divf %175, %174 : vector<16x64xf32>
    %177 = arith.mulf %163, %176 : vector<16x64xf32>
    %178 = arith.mulf %169, %177 : vector<16x64xf32>
    %179 = arith.truncf %178 : vector<16x64xf32> to vector<16x64xbf16>
    %c0_92 = arith.constant 0 : index
    %c0_93 = arith.constant 0 : index
    %180 = vector.load %arg12[%c0_92, %c0_93] : memref<64x32xbf16, #tpu.memory_space<vmem>>, vector<64x32xbf16>
    %cst_94 = arith.constant dense<0.000000e+00> : vector<16x32xf32>
    %181 = tpu.matmul %179, %180, %cst_94 {dimension_numbers = #tpu.dot_dimension_numbers<[1], [0], [0], [1], [0, 0, 1, 1], [], []>} : vector<16x64xbf16>, vector<64x32xbf16>, vector<16x32xf32> -> vector<16x32xf32>
    %182 = arith.addf %181, %1 : vector<16x32xf32>
    %c0_95 = arith.constant 0 : index
    %c0_96 = arith.constant 0 : index
    %c0_97 = arith.constant 0 : index
    %183 = vector.load %arg13[%c0_95, %c0_96, %c0_97] : memref<1x16x32xf32, #tpu.memory_space<vmem>>, vector<1x16x32xf32>
    %184 = vector.shape_cast %183 : vector<1x16x32xf32> to vector<16x32xf32>
    %185 = vector.shape_cast %182 : vector<16x32xf32> to vector<1x16x32xf32>
    tpu.vector_store %arg13[%c0_95, %c0_96, %c0_97], %185 {strides = array<i32>} : memref<1x16x32xf32, #tpu.memory_space<vmem>>, vector<1x16x32xf32>,
    return
  }
  func.func @transform_0(%arg0: i32, %arg1: i32) -> (i32, i32, i32) {
    %c0_i32 = arith.constant 0 : i32
    %c0_i32_0 = arith.constant 0 : i32
    return %arg0, %arg1, %c0_i32 : i32, i32, i32
  }
  func.func @transform_1(%arg0: i32, %arg1: i32) -> (i32, i32) {
    %c0_i32 = arith.constant 0 : i32
    %c0_i32_0 = arith.constant 0 : i32
    %c0_i32_1 = arith.constant 0 : i32
    return %c0_i32, %c0_i32_0 : i32, i32
  }
  func.func @transform_2(%arg0: i32, %arg1: i32) -> (i32, i32) {
    %c0_i32 = arith.constant 0 : i32
    %c0_i32_0 = arith.constant 0 : i32
    %c0_i32_1 = arith.constant 0 : i32
    return %c0_i32, %c0_i32_0 : i32, i32
  }
  func.func @transform_3(%arg0: i32, %arg1: i32) -> (i32, i32) {
    %c0_i32 = arith.constant 0 : i32
    %c0_i32_0 = arith.constant 0 : i32
    %c0_i32_1 = arith.constant 0 : i32
    return %c0_i32, %c0_i32_0 : i32, i32
  }
  func.func @transform_4(%arg0: i32, %arg1: i32) -> (i32, i32) {
    %c0_i32 = arith.constant 0 : i32
    %c0_i32_0 = arith.constant 0 : i32
    %c0_i32_1 = arith.constant 0 : i32
    return %c0_i32, %c0_i32_0 : i32, i32
  }
  func.func @transform_5(%arg0: i32, %arg1: i32) -> (i32, i32) {
    %c0_i32 = arith.constant 0 : i32
    %c0_i32_0 = arith.constant 0 : i32
    %c0_i32_1 = arith.constant 0 : i32
    return %c0_i32, %c0_i32_0 : i32, i32
  }
  func.func @transform_6(%arg0: i32, %arg1: i32) -> (i32, i32) {
    %c0_i32 = arith.constant 0 : i32
    %c0_i32_0 = arith.constant 0 : i32
    %c0_i32_1 = arith.constant 0 : i32
    return %c0_i32, %c0_i32_0 : i32, i32
  }
  func.func @transform_7(%arg0: i32, %arg1: i32) -> (i32, i32) {
    %c0_i32 = arith.constant 0 : i32
    %c0_i32_0 = arith.constant 0 : i32
    %c0_i32_1 = arith.constant 0 : i32
    return %c0_i32, %c0_i32_0 : i32, i32
  }
  func.func @transform_8(%arg0: i32, %arg1: i32) -> (i32, i32) {
    %c0_i32 = arith.constant 0 : i32
    %c0_i32_0 = arith.constant 0 : i32
    %c0_i32_1 = arith.constant 0 : i32
    return %c0_i32, %c0_i32_0 : i32, i32
  }
  func.func @transform_9(%arg0: i32, %arg1: i32) -> (i32, i32) {
    %c0_i32 = arith.constant 0 : i32
    %c0_i32_0 = arith.constant 0 : i32
    %c0_i32_1 = arith.constant 0 : i32
    return %c0_i32, %c0_i32_0 : i32, i32
  }
  func.func @transform_10(%arg0: i32, %arg1: i32) -> (i32, i32) {
    %c0_i32 = arith.constant 0 : i32
    %c0_i32_0 = arith.constant 0 : i32
    %c0_i32_1 = arith.constant 0 : i32
    return %c0_i32, %c0_i32_0 : i32, i32
  }
  func.func @transform_11(%arg0: i32, %arg1: i32) -> (i32, i32, i32) {
    %c0_i32 = arith.constant 0 : i32
    %c0_i32_0 = arith.constant 0 : i32
    return %arg0, %arg1, %c0_i32 : i32, i32, i32
  }
}

</mosaic_0001>

<bundles_post_ra>
// kernel: tpu_custom_call.1
= control target key start
LH: loop header
LB: loop body
LE: loop exit
PB: predicated region body
PF: predicated region fallthrough
CT: control target
= control target key end

     0   :  { %s3357_s0 = inlined_call_operand.vmem [shape: f32[2,32,32], index: 0, kind: input, shape index: {}]   ;;  %s3358_s1 = inlined_call_operand.hbm [shape: f32[1,32], index: 1, kind: input, shape index: {}]   ;;  %s3359_s2 = inlined_call_operand.hbm [shape: f32[1,32], index: 2, kind: input, shape index: {}]   ;;  %s3360_s3 = inlined_call_operand.hbm [shape: bf16[32,128], index: 3, kind: input, shape index: {}]   ;;  %s3361_s4 = inlined_call_operand.hbm [shape: f32[4,64], index: 4, kind: input, shape index: {}]   ;;  %s3362_s5 = inlined_call_operand.vmem [shape: f32[1,64], index: 5, kind: input, shape index: {}]   ;;  %s3363_s6 = inlined_call_operand.hbm [shape: bf16[64,96], index: 6, kind: input, shape index: {}]   ;;  %s3364_s7 = inlined_call_operand.vmem [shape: f32[1,64], index: 7, kind: input, shape index: {}]   ;;  %s3365_s8 = inlined_call_operand.vmem [shape: f32[16,1], index: 8, kind: input, shape index: {}]   ;;  %s3366_s9 = inlined_call_operand.vmem [shape: f32[1,64], index: 9, kind: input, shape index: {}]   ;;  %s3367_s10 = inlined_call_operand.vmem [shape: bf16[64,32], index: 10, kind: input, shape index: {}]   ;;  %s3368_s11 = inlined_call_operand.hbm [shape: f32[2,32,32], index: 11, kind: output, shape index: {}]  }
   0x1   :  { %3383 = sst [smem:[#allocation35_spill]] %s3358_s1 }
   0x2   :  { %3384 = sst [smem:[#allocation36_spill]] %s3359_s2 }
   0x3   :  { %3385 = sst [smem:[#allocation37_spill]] %s3368_s11 }
   0x4   :  { %16 = vsyncpa [#allocation13], 0 }
   0x5   :  { %17 = vsyncpa [#allocation16], 0 }
   0x6   :  { %18 = vsyncpa [#allocation19], 0 }
   0x7   :  { %19 = vsyncpa [#allocation14], 0 }
   0x8   :  { %21 = vsyncpa [#allocation14 + $0x1], 0  ;;  %s2723_s17 = smov 0   ;;  %s2725_s18 = smov 0  }
   0x9   :  { %s2727_s19 = smov 0   ;;  %s2729_s20 = smov 0  }
   0xa   :  { %s2731_s21 = smov 0   ;;  %s2733_s22 = smov 0  }
   0xb   :  { %s2735_s23 = smov 0   ;;  %s2737_s24 = smov 0  }
   0xc LB: > { %3386 = sst [smem:[#allocation26_spill]] %s2604_s17  ;;  %s1908_s25 = sadd.s32 4294967295, %s2632_s24   ;;  %s2632_s24 = sphi %s2737_s24, %s27_s24   ;;  %s2628_s23 = sphi %s2735_s23, %s3418_s23   ;;  %s2624_s22 = sphi %s2733_s22, %s3417_s22   ;;  %s2620_s21 = sphi %s2731_s21, %s3416_s21   ;;  %s2616_s20 = sphi %s2729_s20, %s3415_s20   ;;  %s2612_s19 = sphi %s2727_s19, %s3414_s19   ;;  %s2608_s18 = sphi %s2725_s18, %s3420_s18   ;;  %s2604_s17 = sphi %s2723_s17, %s3419_s17  }
   0xd   : > { %3387 = sst [smem:[#allocation27_spill]] %s2612_s19  ;;  %s1909_s26 = sadd.s32 4294967294, %s2632_s24  }
   0xe   : > { %3388 = sst [smem:[#allocation28_spill]] %s2624_s22  ;;  %s36_s27 = sadd.s32 1, %s2624_s22 }
   0xf   : > { %3389 = sst [smem:[#allocation29_spill]] %s2628_s23  ;;  %s39_s28 = sadd.s32 1, %s2628_s23 }
  0x10   : > { %3390 = sst [smem:[#allocation30_spill]] %s2632_s24  ;;  %p37_p0 = scmp.ge.s32.totalorder %s36_s27, 2 }
  0x11   : > { %s286_s29 = sadd.s32 1, %s2612_s19  ;;  %p296_p1 = scmp.ne.s32.totalorder %s2612_s19, %s2608_s18 }
  0x12   : > { %p297_p2 = scmp.eq.s32.totalorder %s1908_s25, 3  ;;  %s3422_s27 = smov (%p37_p0, %s36_s27), 0 }
  0x13   : > { %3391 = sst [smem:[#allocation31_spill]] %s3422_s27  ;;  %s3424_s28 = smov (!%p37_p0, %s39_s28), %s2628_s23 }
  0x14   : > { %s282_s30 = ssub.s32 %s2624_s22, %s3422_s27  ;;  %p2775_p3 = por %p297_p2, %p296_p1 }
  0x15   : > { %p41_p4 = scmp.ge.s32.totalorder %s3424_s28, 2  ;;  %p302_p5 = scmp.ne.s32.totalorder %s2608_s18, %s2604_s17 }
  0x16   : > { %s3392_s12 = scalar_select %p2775_p3, 1, 0 }
  0x17   : > { %p303_p6 = scmp.eq.s32.totalorder %s1909_s26, 3  ;;  %p1910_p7 = scmp.ge.s32.totalorder %s2632_s24, 1 }
  0x18   : > { %s3426_s28 = smov (%p41_p4, %s3424_s28), 0  ;;  %p310_p9 = scmp.lt.s32.totalorder %s2632_s24, 5 }
  0x19   : > { %3393 = sst [smem:[#allocation32_spill]] %s3426_s28  ;;  %p2784_p8 = por %p303_p6, %p302_p5 }
  0x1a   : > { %s281_s14 = ssub.s32 %s2628_s23, %s3426_s28  ;;  %p2791_p10 = pnand %p1910_p7, %p310_p9 }
  0x1b   : > { %s3394_s13 = scalar_select %p2784_p8, 1, 0 }
  0x1c   : > { %s283_s15 = sor.u32 %s282_s30, %s281_s14  ;;  %p2795_p12 = scmp.eq.s32.totalorder %s1908_s25, 0 }
  0x1d   : > { %3395 = sst [smem:[#allocation33_spill]] %s3394_s13  ;;  %p284_p11 = scmp.eq.s32.totalorder %s283_s15, 0 }
  0x1e   : > { %s3396_s16 = scalar_select %p2791_p10, 1, 0 }
  0x1f   : > { %s3397_s27 = scalar_select %p2795_p12, 1, 0 }
  0x20   : > { %p2121_p13 = pneg %p2791_p10  ;;  %s2638_s30 = smov [#allocation15]  }
  0x21   : > { %s2802_s26 = scalar_select %p284_p11, %s2612_s19, %s286_s29  }
  0x22   : > { %p2806_p0 = pnand %p2795_p12, %p2121_p13  ;;  %s334_s14 = sshll.u32 %s2638_s30, 4  ;;  %s335_s14 = int_to_ptr.vmem [resolvable:$true] %s334_s14 }
  0x23   : > { %3398 = sst [smem:[#allocation34_spill]] %s2802_s26  ;;  %s2639_s28 = smov [#allocation18]  }
  0x24   : > { %s358_s15 = sshll.u32 %s2639_s28, 4  ;;  %s3400_s2 = sld [smem:[#allocation36_spill]]  ;;  %s359_s15 = int_to_ptr.vmem [resolvable:$true] %s358_s15 }
  0x25   : > { %p2818_p2 = pneg %p2806_p0 }
  0x2a   : > { %s2382_s13 = scalar_lea.hbm %s3400_s2, 16 }
  0x2b   : > { %p2383_p1 = scmp.ne.s32.totalorder %s3400_s2, %s2382_s13  ;;  %p2389_p6 = scmp.lt.u32.totalorder %s2382_s13, %s3400_s2 }
  0x2d   : > { %p2385_p4 = pnand %p2818_p2, %p2383_p1 }
  0x2f   : > { %p2386_p5 = pneg %p2385_p4 }
  0x31   : > { %p2391_p7 = pnand %p2389_p6, %p2386_p5 }
  0x33   : > { %2394 = shalt.err (!%p2391_p7)
}
  0x34   : > { %s2395_s23 = scalar_lea.vmem %s335_s14, 16  ;;  %s2402_s17 = scalar_lea.vmem %s335_s14, 32 }
  0x35   : > { %p2396_p9 = scmp.ne.s32.totalorder %s335_s14, %s2395_s23  ;;  %p2403_p8 = scmp.lt.s32.totalorder %s335_s14, %s335_s14 }
  0x36   : > { %p2404_p3 = scmp.lt.s32.totalorder %s2402_s17, %s2395_s23 }
  0x37   : > { %p2398_p11 = pnand %p2396_p9, %p2818_p2 }
  0x38   : > { %p2405_p12 = por %p2404_p3, %p2403_p8 }
  0x39   : > { %p2399_p13 = pneg %p2398_p11 }
  0x3b   : > { %p2406_p10 = pnand %p2405_p12, %p2399_p13 }
  0x3d   : > { %2409 = shalt.err (!%p2406_p10)
}
  0x3e   : > { %2127 = dma.hbm_to_vmem [thread:$0]  (!%p2806_p0), %s3400_s2, 16, %s335_s14, [#allocation16]  }
  0x3f   : > { %s2410_s25 = scalar_lea.hbm %s3361_s4, 64 }
  0x40   : > { %p2411_p1 = scmp.ne.s32.totalorder %s3361_s4, %s2410_s25  ;;  %p2417_p10 = scmp.lt.u32.totalorder %s2410_s25, %s3361_s4 }
  0x42   : > { %p2413_p3 = pnand %p2411_p1, %p2818_p2 }
  0x44   : > { %p2414_p8 = pneg %p2413_p3 }
  0x46   : > { %p2419_p12 = pnand %p2417_p10, %p2414_p8 }
  0x48   : > { %2422 = shalt.err (!%p2419_p12)
}
  0x49   : > { %s2423_s24 = scalar_lea.vmem %s359_s15, 64  ;;  %p2431_p7 = scmp.lt.s32.totalorder %s359_s15, %s359_s15 }
  0x4a   : > { %p2424_p4 = scmp.ne.s32.totalorder %s359_s15, %s2423_s24  ;;  %p2432_p9 = scmp.lt.s32.totalorder %s2423_s24, %s2423_s24 }
  0x4c   : > { %p2426_p5 = pnand %p2424_p4, %p2818_p2  ;;  %p2433_p11 = por %p2432_p9, %p2431_p7 }
  0x4e   : > { %p2427_p6 = pneg %p2426_p5 }
  0x50   : > { %p2434_p13 = pnand %p2433_p11, %p2427_p6 }
  0x52   : > { %2437 = shalt.err (!%p2434_p13)
}
  0x53   : > { %2133 = dma.hbm_to_vmem [thread:$0]  (!%p2806_p0), %s3361_s4, 64, %s359_s15, [#allocation19]  }
  0x54   : > { %s2640_s28 = smov [#allocation12]   ;;  %s2641_s26 = smov [#allocation17]  }
  0x55   : > { %s323_s13 = sshll.u32 %s2640_s28, 4  ;;  %s344_s25 = sshll.u32 %s2641_s26, 4  ;;  %s324_s13 = int_to_ptr.vmem [resolvable:$true] %s323_s13  ;;  %s345_s25 = int_to_ptr.vmem [resolvable:$true] %s344_s25 }
  0x56   : > { %s3402_s1 = sld [smem:[#allocation35_spill]] }
  0x5c   : > { %s2438_s17 = scalar_lea.hbm %s3402_s1, 16 }
  0x5d   : > { %p2439_p1 = scmp.ne.s32.totalorder %s3402_s1, %s2438_s17  ;;  %p2445_p10 = scmp.lt.u32.totalorder %s2438_s17, %s3402_s1 }
  0x5f   : > { %p2441_p3 = pnand %p2439_p1, %p2818_p2 }
  0x61   : > { %p2442_p8 = pneg %p2441_p3 }
  0x63   : > { %p2447_p12 = pnand %p2445_p10, %p2442_p8 }
  0x65   : > { %2450 = shalt.err (!%p2447_p12)
}
  0x66   : > { %s2451_s15 = scalar_lea.vmem %s324_s13, 16  ;;  %s2458_s14 = scalar_lea.vmem %s324_s13, 32 }
  0x67   : > { %p2452_p4 = scmp.ne.s32.totalorder %s324_s13, %s2451_s15  ;;  %p2459_p7 = scmp.lt.s32.totalorder %s324_s13, %s324_s13 }
  0x68   : > { %p2460_p9 = scmp.lt.s32.totalorder %s2458_s14, %s2451_s15 }
  0x69   : > { %p2454_p5 = pnand %p2452_p4, %p2818_p2 }
  0x6a   : > { %p2461_p11 = por %p2460_p9, %p2459_p7 }
  0x6b   : > { %p2455_p6 = pneg %p2454_p5 }
  0x6d   : > { %p2462_p13 = pnand %p2461_p11, %p2455_p6 }
  0x6f   : > { %2465 = shalt.err (!%p2462_p13)
}
  0x70   : > { %2124 = dma.hbm_to_vmem [thread:$0]  (!%p2806_p0), %s3402_s1, 16, %s324_s13, [#allocation13]  }
  0x71   : > { %s2466_s30 = scalar_lea.hbm %s3360_s3, 256 }
  0x72   : > { %p2467_p1 = scmp.ne.s32.totalorder %s3360_s3, %s2466_s30  ;;  %p2473_p10 = scmp.lt.u32.totalorder %s2466_s30, %s3360_s3 }
  0x74   : > { %p2469_p3 = pnand %p2467_p1, %p2818_p2 }
  0x76   : > { %p2470_p8 = pneg %p2469_p3 }
  0x78   : > { %p2475_p12 = pnand %p2473_p10, %p2470_p8 }
  0x7a   : > { %2478 = shalt.err (!%p2475_p12)
}
  0x7b   : > { %s2479_s15 = scalar_lea.vmem %s345_s25, 256  ;;  %p2487_p7 = scmp.lt.s32.totalorder %s345_s25, %s345_s25 }
  0x7c   : > { %p2480_p4 = scmp.ne.s32.totalorder %s345_s25, %s2479_s15  ;;  %p2488_p9 = scmp.lt.s32.totalorder %s2479_s15, %s2479_s15 }
  0x7e   : > { %p2482_p5 = pnand %p2480_p4, %p2818_p2  ;;  %p2489_p11 = por %p2488_p9, %p2487_p7 }
  0x80   : > { %p2483_p6 = pneg %p2482_p5 }
  0x82   : > { %p2490_p13 = pnand %p2489_p11, %p2483_p6 }
  0x84   : > { %2493 = shalt.err (!%p2490_p13)
}
  0x85   : > { %s2642_s13 = smov 64   ;;  %s2643_s14 = smov 4  }
  0x86   : > { %2130 = dma.hbm_to_vmem [thread:$0]  (!%p2806_p0), %s3360_s3, 256, %s345_s25, [#allocation16], %s2642_s13, %s2642_s13, %s2643_s14  }
  0x87   : > { %s2644_s11 = smov [#allocation20]   ;;  %s2494_s17 = scalar_lea.hbm %s3363_s6, 512 }
  0x88   : > { %s371_s26 = sshll.u32 %s2644_s11, 4  ;;  %p2495_p1 = scmp.ne.s32.totalorder %s3363_s6, %s2494_s17  ;;  %s372_s26 = int_to_ptr.vmem [resolvable:$true] %s371_s26 }
  0x89   : > { %p2501_p10 = scmp.lt.u32.totalorder %s2494_s17, %s3363_s6 }
  0x8a   : > { %p2497_p3 = pnand %p2495_p1, %p2818_p2 }
  0x8c   : > { %p2498_p8 = pneg %p2497_p3 }
  0x8e   : > { %p2503_p12 = pnand %p2501_p10, %p2498_p8 }
  0x90   : > { %2506 = shalt.err (!%p2503_p12)
}
  0x91   : > { %s2507_s25 = scalar_lea.vmem %s372_s26, 512  ;;  %p2515_p7 = scmp.lt.s32.totalorder %s372_s26, %s372_s26 }
  0x92   : > { %p2508_p4 = scmp.ne.s32.totalorder %s372_s26, %s2507_s25  ;;  %p2516_p9 = scmp.lt.s32.totalorder %s2507_s25, %s2507_s25 }
  0x94   : > { %p2510_p5 = pnand %p2508_p4, %p2818_p2  ;;  %p2517_p11 = por %p2516_p9, %p2515_p7 }
  0x96   : > { %p2511_p6 = pneg %p2510_p5 }
  0x98   : > { %p2518_p13 = pnand %p2517_p11, %p2511_p6 }
  0x9a   : > { %2521 = shalt.err (!%p2518_p13)
}
  0x9b   : > { %2136 = dma.hbm_to_vmem [thread:$0]  (!%p2806_p0), %s3363_s6, 512, %s372_s26, [#allocation19], %s2642_s13, %s2642_s13, %s2643_s14  }
  0x9c   : > { %p3403_p1 = scmp.ne.s32.totalorder %s3396_s16, 0 }
  0x9d   : > { %p3404_p3 = scmp.ne.s32.totalorder (!%p3403_p1), %s3397_s27, 0 }
  0x9e   : > { %412 = sbr.rel (%p3403_p1) target bundleno = 2057 (0x809), region = 64 }
  0xa5   : > { %2587 = dma.done.wait (%p3404_p3), [#allocation13], 16  }
  0xa6   : > { %2589 = vsyncadd (%p3404_p3), [#allocation13], 4294967280 }
  0xa7   : > { %2591 = dma.done.wait (%p3404_p3), [#allocation16], 272  }
  0xa8   : > { %2593 = vsyncadd (%p3404_p3), [#allocation16], 4294967024 }
  0xa9   : > { %2595 = dma.done.wait (%p3404_p3), [#allocation19], 576  }
  0xaa   : > { %2597 = vsyncadd (%p3404_p3), [#allocation19], 4294966720  ;;  %s2921_s1 = sshll.u32 %s2616_s20, 1  ;;  %p473_p0 = scmp.lt.s32.totalorder %s2620_s21, 1  ;;  %vm486_vm0 = vcmask 261120   ;;  %v2249_v14 = vld [vmem:[#allocation17] sm:$0xff]  }
  0xab   : > { %p475_p2 = scmp.lt.s32.totalorder %s2921_s1, 3  ;;  %s469_s30 = sand.u32 1, %s2608_s18   ;;  %v2645_v15 = vmov 0.0   ;;  %v2250_v16 = vld [vmem:[#allocation17 + $0x8] sm:$0xff]   ;;  %vm2646_vm1 = vmmov 0   ;;  %vm601_vm2 = vcmask 523264  }
  0xac   : > { %s474_s22 = scalar_select %p473_p0, %s2620_s21, 1  ;;  %2067 = vmatprep.subr.bf16.mxu0 %v2645_v15  ;;  %2071 = vmatprep.mubr.msk.bf16.mxu0 %vm2646_vm1, %v2645_v15  ;;  %v1927_v25 = vld [vmem:[#allocation12] ss:$0 sm:$0xff]  ;;  %v1928_v29 = vld [vmem:[#allocation15] ss:$0 sm:$0xff] }
  0xad   : > { %s476_s16 = scalar_select %p475_p2, %s2921_s1, 3  ;;  %2068 = vmatpush3.bf16.msra.mxu0 %v2249_v14 }
  0xae   : > { %s1925_s29 = sshll.u32 %s474_s22, 2  ;;  %s2946_s23 = sshll.u32 %s469_s30, 4  ;;  %2069 = vmatprep.subr.bf16.mxu0 %v2645_v15 }
  0xaf   : > { %s478_s13 = sadd.s32 %s1925_s29, %s476_s16  ;;  %s2647_s17 = smov 64  }
  0xb0   : > { %s1926_s14 = sshll.u32 %s478_s13, 3  ;;  %s2957_s24 = scalar_lea.vmem [#allocation21], %s2946_s23 }
  0xb1   : > { %s480_s27 = scalar_lea.vmem %s3357_s0, %s1926_s14  ;;  %2070 = vmatpush3.bf16.msra.mxu0 %v2250_v16  ;;  %p1932_p8 = scmp.ne.s32.totalorder %s2616_s20, 0 }
  0xb2   : > { %v2930_v0 = vld [vmem:[%s480_s27] sm:$0xff]  ;;  %v2932_v1 = vld [vmem:[%s480_s27 + $0x8] sm:$0xff]  ;;  %vm608_vm3 = vcmask (!%p1932_p8), 518144   ;;  %v2648_v40 = vmov (!%p1932_p8), 0.0  }
  0xb3   : > { %v487_v2 = vsel %vm486_vm0, %v2930_v0, 0.0  ;;  %v490_v3 = vsel %vm486_vm0, %v2932_v1, 0.0  ;;  %609 = vst.msk [vmem:[#allocation2] sm:$0x7] (!%p1932_p8), %vm608_vm3, %v2648_v40 }
  0xb4   : > { %488 = vadd.xlane.f32.xlu0 %v487_v2 }
  0xb8   : > { %491 = vadd.xlane.f32.xlu0 %v490_v3 }
 0x141   : > { %v489_v4 = vpop.xlane.xlu0 %488 }
 0x142   : > { %v494_v5 = vmul.f32 0.03125, %v489_v4 }
 0x144   : > { %v496_v6 = vsub.f32 %v2930_v0, %v494_v5 }
 0x145   : > { %v492_v7 = vpop.xlane.xlu0 %491 }
 0x146   : > { %v495_v8 = vmul.f32 0.03125, %v492_v7  ;;  %v498_v9 = vmul.f32 %v496_v6, %v496_v6 }
 0x148   : > { %v497_v10 = vsub.f32 %v2932_v1, %v495_v8  ;;  %v500_v11 = vsel %vm486_vm0, %v498_v9, 0.0 }
 0x149   : > { %501 = vadd.xlane.f32.xlu1 %v500_v11 }
 0x14a   : > { %v499_v12 = vmul.f32 %v497_v10, %v497_v10 }
 0x14c   : > { %v503_v13 = vsel %vm486_vm0, %v499_v12, 0.0 }
 0x14d   : > { %504 = vadd.xlane.f32.xlu1 %v503_v13 }
 0x1d6   : > { %v502_v17 = vpop.xlane.xlu1 %501 }
 0x1d7   : > { %v506_v18 = vmul.f32 0.03125, %v502_v17 }
 0x1d9   : > { %v508_v19 = vadd.f32 1e-05, %v506_v18 }
 0x1da   : > { %v505_v20 = vpop.xlane.xlu1 %504 }
 0x1db   : > { %2251 = vrsqrt.f32 %v508_v19  ;;  %v507_v21 = vmul.f32 0.03125, %v505_v20 }
 0x1dd   : > { %v509_v22 = vadd.f32 1e-05, %v507_v21 }
 0x1df   : > { %2253 = vrsqrt.f32 %v509_v22 }
 0x1e5   : > { %v2252_v23 = vpop.eup %2251 }
 0x1e6   : > { %v512_v24 = vmul.f32 %v2252_v23, %v496_v6 }
 0x1e8   : > { %v521_v28 = vmul.f32 %v1927_v25, %v512_v24 }
 0x1e9   : > { %v2254_v26 = vpop.eup %2253 }
 0x1ea   : > { %v513_v27 = vmul.f32 %v2254_v26, %v497_v10  ;;  %v530_v31 = vadd.f32 %v1928_v29, %v521_v28 }
 0x1ec   : > { %v522_v30 = vmul.f32 %v1927_v25, %v513_v27 }
 0x1ee   : > { %v531_v32 = vadd.f32 %v1928_v29, %v522_v30 }
 0x1f0   : > { %v532_v33 = vpack.c.bf16 %v531_v32, %v530_v31 }
 0x1f2   : > { %2072 = vmatmul.mubr.msk.bf16.vlgmr.msra.gmra.mrb[0].mxu0 %vm486_vm0, %v532_v33 }
 0x2c5   : > { %v586_v34 = vpop.f32.mrb[0].mxu0 }
 0x2c6   : > { %595 = vrot.lane.b32.xlu0 %v586_v34, %s2647_s17  ;;  %v2073_v35 = vpop.f32.mrb[1].mxu0 }
 0x2c7   : > { %v589_v36 = vpop.f32.mrb[2].mxu0 }
 0x2c8   : > { %597 = vrot.lane.b32.xlu1 %v589_v36, %s2647_s17  ;;  %v2074_v37 = vpop.f32.mrb[3].mxu0 }
 0x335   : > { %607 = sbr.rel (%p1932_p8) target bundleno = 828 (0x33c), region = 88 }
 0x338   : > { %v596_v38 = vpop.permute.xlu0 %595 }
 0x339   : > { %602 = vst.msk [vmem:[#allocation5] sm:$0xff] %vm601_vm2, %v596_v38 }
 0x33a   : > { %v598_v39 = vpop.permute.xlu1 %597 }
 0x33b   : > { %603 = vst.msk [vmem:[#allocation5 + $0x8] sm:$0xff] %vm601_vm2, %v598_v39 }
 0x33c PF: > { %2075 = vmatprep.subr.bf16.mxu1 %v2645_v15  ;;  %v2255_v41 = vld [vmem:[#allocation20] sm:$0xff]   ;;  %2083 = vmatprep.mubr.msk.bf16.mxu1 %vm2646_vm1, %v2645_v15  ;;  %613 = vst.msk [vmem:[#allocation3 + $0x3] sm:$0xff] %vm601_vm2, %v586_v34  ;;  %614 = vst.msk [vmem:[#allocation3 + $0xb] sm:$0xff] %vm601_vm2, %v589_v36  ;;  %vm611_vm4 = vcmask 518144   ;;  %v2256_v42 = vld [vmem:[#allocation20 + $0x8] sm:$0xff]   ;;  %vm615_vm5 = vcmask 523269  }
 0x33d   : > { %2076 = vmatpush3.bf16.msra.mxu1 %v2255_v41  ;;  %v610_v43 = vld [vmem:[#allocation2] sm:$0x7]  ;;  %v2257_v47 = vld [vmem:[#allocation20 + $0x10] sm:$0xff]   ;;  %v1937_v48 = vld [vmem:[#allocation18 + $0x3] ss:$0 sm:$0xff]  ;;  %vm648_vm6 = vcmask 1046528  }
 0x33e   : > { %2077 = vmatprep.subr.bf16.mxu1 %v2645_v15  ;;  %612 = vst.msk [vmem:[#allocation3] sm:$0x7] %vm611_vm4, %v610_v43  ;;  %v1934_v44 = vld [vmem:[#allocation18] ss:$0 sm:$0xff]  ;;  %v1935_v45 = vld [vmem:[#allocation18 + $0x1] ss:$0 sm:$0xff] }
 0x33f   : > { %616 = vst.msk [vmem:[#allocation2 - $0x5] sm:$0xe0] %vm615_vm5, %v589_v36  ;;  %v1936_v46 = vld [vmem:[#allocation18 + $0x2] ss:$0 sm:$0xff]  ;;  %v1933_v51 = vld [vmem:[%s3362_s5] ss:$0 sm:$0xff] }
 0x340   : > { %vm669_vm7 = vcmask 1045504   ;;  %v2258_v59 = vld [vmem:[#allocation20 + $0x18] sm:$0xff]   ;;  %vm690_vm8 = vcmask 1044480   ;;  %s2649_s28 = smov 48   ;;  %vm828_vm11 = vcmask 130048  }
 0x341   : > { %2078 = vmatpush3.bf16.msra.mxu1 %v2256_v42  ;;  %v1943_v40 = vld [vmem:[%s3364_s7] ss:$0 sm:$0xff] }
 0x342   : > { %2079 = vmatprep.subr.bf16.mxu1 %v2645_v15 }
 0x343   : > { %v618_v49 = vld [vmem:[#allocation3 + $0x8] sm:$0xff]  ;;  %v619_v50 = vld [vmem:[#allocation3 + $0x10] sm:$0x7] }
 0x344   : > { %v634_v52 = vmul.f32 %v1934_v44, %v618_v49  ;;  %v643_v53 = vmul.f32 %v1935_v45, %v618_v49  ;;  %v644_v54 = vmul.f32 %v1935_v45, %v619_v50  ;;  %v664_v55 = vmul.f32 %v1936_v46, %v618_v49 }
 0x345   : > { %v665_v56 = vmul.f32 %v1936_v46, %v619_v50  ;;  %v685_v57 = vmul.f32 %v1937_v48, %v618_v49  ;;  %v686_v58 = vmul.f32 %v1937_v48, %v619_v50  ;;  %2080 = vmatpush3.bf16.msra.mxu1 %v2257_v47  ;;  %v617_v5 = vld [vmem:[#allocation3] sm:$0xff] }
 0x346   : > { %v636_v60 = vadd.f32 %v1933_v51, %v634_v52  ;;  %v650_v61 = vrot.slane %v643_v53, 1  ;;  %v652_v62 = vrot.slane %v644_v54, 1  ;;  %v671_v63 = vrot.slane %v664_v55, 2  ;;  %2081 = vmatprep.subr.bf16.mxu1 %v2645_v15 }
 0x347   : > { %v673_v2 = vrot.slane %v665_v56, 2  ;;  %v692_v3 = vrot.slane %v685_v57, 3  ;;  %v694_v4 = vrot.slane %v686_v58, 3  ;;  %v633_v7 = vmul.f32 %v1934_v44, %v617_v5 }
 0x348   : > { %v653_v6 = vsel %vm648_vm6, %v650_v61, %v652_v62  ;;  %v642_v8 = vmul.f32 %v1935_v45, %v617_v5  ;;  %v663_v10 = vmul.f32 %v1936_v46, %v617_v5  ;;  %v684_v12 = vmul.f32 %v1937_v48, %v617_v5 }
 0x349   : > { %v657_v9 = vadd.f32 %v653_v6, %v636_v60  ;;  %2082 = vmatpush3.bf16.msra.mxu1 %v2258_v59  ;;  %v674_v11 = vsel %vm669_vm7, %v671_v63, %v673_v2  ;;  %v695_v13 = vsel %vm690_vm8, %v692_v3, %v694_v4  ;;  %v635_v14 = vadd.f32 %v1933_v51, %v633_v7 }
 0x34a   : > { %v649_v16 = vrot.slane %v642_v8, 1  ;;  %v670_v17 = vrot.slane %v663_v10, 2  ;;  %v691_v19 = vrot.slane %v684_v12, 3 }
 0x34b   : > { %v678_v18 = vadd.f32 %v674_v11, %v657_v9 }
 0x34c   : > { %v651_v20 = vsel %vm648_vm6, %v649_v16, %v650_v61  ;;  %v672_v21 = vsel %vm669_vm7, %v670_v17, %v671_v63  ;;  %v693_v24 = vsel %vm690_vm8, %v691_v19, %v692_v3  ;;  %v2650_v3 = vmov (!%p1932_p8), 0.0  }
 0x34d   : > { %v699_v22 = vadd.f32 %v695_v13, %v678_v18  ;;  %v656_v23 = vadd.f32 %v651_v20, %v635_v14  ;;  %842 = vst.msk [vmem:[#allocation10] sm:$0xff] (!%p1932_p8), %vm601_vm2, %v2650_v3  ;;  %843 = vst.msk [vmem:[#allocation10 + $0x8] sm:$0xff] (!%p1932_p8), %vm601_vm2, %v2650_v3 }
 0x34f   : > { %v701_v25 = vsub.f32 0.0, %v699_v22  ;;  %v677_v26 = vadd.f32 %v672_v21, %v656_v23 }
 0x351   : > { %v704_v27 = vmul.f32 1.442695, %v701_v25  ;;  %v698_v28 = vadd.f32 %v693_v24, %v677_v26 }
 0x353   : > { %2259 = vpow2.f32 %v704_v27  ;;  %v700_v29 = vsub.f32 0.0, %v698_v28 }
 0x355   : > { %v702_v30 = vmul.f32 1.442695, %v700_v29 }
 0x357   : > { %2261 = vpow2.f32 %v702_v30 }
 0x35d   : > { %v2260_v31 = vpop.eup %2259 }
 0x35e   : > { %v707_v32 = vadd.f32 1.0, %v2260_v31 }
 0x360   : > { %2263 = vrcp.f32 %v707_v32 }
 0x361   : > { %v2262_v33 = vpop.eup %2261 }
 0x362   : > { %v706_v34 = vadd.f32 1.0, %v2262_v33 }
 0x364   : > { %2265 = vrcp.f32 %v706_v34 }
 0x36a   : > { %v2264_v35 = vpop.eup %2263 }
 0x36b   : > { %v713_v36 = vmul.f32 %v2264_v35, %v699_v22 }
 0x36d   : > { %715 = vst.msk [vmem:[#allocation4 + $0x8] sm:$0xff] %vm601_vm2, %v713_v36 }
 0x36e   : > { %v2266_v37 = vpop.eup %2265 }
 0x36f   : > { %v712_v38 = vmul.f32 %v2266_v37, %v698_v28 }
 0x371   : > { %714 = vst.msk [vmem:[#allocation4] sm:$0xff] %vm601_vm2, %v712_v38  ;;  %v716_v39 = vpack.c.bf16 %v713_v36, %v712_v38 }
 0x373   : > { %2084 = vmatmul.mubr.msk.bf16.vlgmr.msra.gmra.mrb[0].mxu1 %vm601_vm2, %v716_v39 }
 0x446   : > { %v786_v41 = vpop.f32.mrb[0].mxu1 }
 0x447   : > { %v800_v42 = vadd.f32 %v1943_v40, %v786_v41  ;;  %831 = vrot.lane.b32.xlu1 %v786_v41, %s2649_s28  ;;  %822 = vrot.lane.b32.xlu0 %v786_v41, %s2647_s17  ;;  %v2085_v43 = vpop.f32.mrb[1].mxu1 }
 0x448   : > { %v789_v44 = vpop.f32.mrb[2].mxu1 }
 0x449   : > { %v804_v45 = vmin.f32 %v800_v42, 20.0  ;;  %v801_v46 = vadd.f32 %v1943_v40, %v789_v44  ;;  %v2086_v47 = vpop.f32.mrb[3].mxu1  ;;  %vm802_vm9 = vcmp.gt.f32.partialorder %v800_v42, 20.0 }
 0x44b   : > { %v806_v48 = vmul.f32 1.442695, %v804_v45  ;;  %v805_v49 = vmin.f32 %v801_v46, 20.0  ;;  %833 = vrot.lane.b32.xlu1 %v789_v44, %s2649_s28  ;;  %824 = vrot.lane.b32.xlu0 %v789_v44, %s2647_s17  ;;  %vm803_vm10 = vcmp.gt.f32.partialorder %v801_v46, 20.0 }
 0x44d   : > { %2267 = vpow2.f32 %v806_v48  ;;  %v808_v50 = vmul.f32 1.442695, %v805_v49 }
 0x44f   : > { %2269 = vpow2.f32 %v808_v50 }
 0x457   : > { %v2268_v51 = vpop.eup %2267 }
 0x458   : > { %v810_v52 = vadd.f32 1.0, %v2268_v51 }
 0x459   : > { %v2270_v53 = vpop.eup %2269 }
 0x45a   : > { %2271 = vlog2.f32 %v810_v52  ;;  %v811_v54 = vadd.f32 1.0, %v2270_v53 }
 0x45c   : > { %2273 = vlog2.f32 %v811_v54 }
 0x464   : > { %v2272_v55 = vpop.eup %2271 }
 0x465   : > { %v813_v56 = vmul.f32 0.6931472, %v2272_v55 }
 0x466   : > { %v2274_v57 = vpop.eup %2273 }
 0x467   : > { %v816_v58 = vsel %vm802_vm9, %v800_v42, %v813_v56  ;;  %v815_v59 = vmul.f32 0.6931472, %v2274_v57 }
 0x468   : > { %818 = vst.msk [vmem:[#allocation6] sm:$0xff] %vm601_vm2, %v816_v58 }
 0x469   : > { %v817_v60 = vsel %vm803_vm10, %v801_v46, %v815_v59 }
 0x46a   : > { %819 = vst.msk [vmem:[#allocation6 + $0x8] sm:$0xff] %vm601_vm2, %v817_v60 }
 0x4b8   : > { %841 = sbr.rel (%p1932_p8) target bundleno = 1215 (0x4bf), region = 92 }
 0x4b9   : > { %v832_v61 = vpop.permute.xlu1 %831  ;;  %v823_v62 = vpop.permute.xlu0 %822 }
 0x4ba   : > { %837 = vst.msk [vmem:[#allocation8] sm:$0xff] %vm828_vm11, %v832_v61  ;;  %829 = vst.msk [vmem:[#allocation7] sm:$0xff] %vm828_vm11, %v823_v62 }
 0x4bd   : > { %v834_v63 = vpop.permute.xlu1 %833  ;;  %v825_v2 = vpop.permute.xlu0 %824 }
 0x4be   : > { %838 = vst.msk [vmem:[#allocation8 + $0x8] sm:$0xff] %vm828_vm11, %v834_v63  ;;  %830 = vst.msk [vmem:[#allocation7 + $0x8] sm:$0xff] %vm828_vm11, %v825_v2 }
 0x4bf PF: > { %v844_v4 = vld [vmem:[%s3365_s8] sm:$0xff]  ;;  %v2651_v5 = vmov 0   ;;  %v845_v6 = vld [vmem:[%s3365_s8 + $0x8] sm:$0xff]  ;;  %v857_v7 = vlaneseq  ;;  %s3059_s20 = smov 0  }
 0x4c0   : > { %2275 = vset.pattern.permute.xlu0 %v2651_v5  ;;  %v846_v13 = vld [vmem:[#allocation6] sm:$0xff] }
 0x4c1   : > { %849 = vperm.xlu0 %2275, %v844_v4   ;;  %v858_v8 = vshrl.u32 %v857_v7, 7 }
 0x4c3   : > { %v2999_v9 = vsub.s32 0, %v858_v8  ;;  %v3001_v10 = vsub.s32 1, %v858_v8  ;;  %v3003_v11 = vsub.s32 2, %v858_v8  ;;  %v3005_v12 = vsub.s32 3, %v858_v8 }
 0x4c4   : > { %v3007_v14 = vsub.s32 4, %v858_v8  ;;  %v3009_v16 = vsub.s32 5, %v858_v8  ;;  %v3011_v17 = vsub.s32 6, %v858_v8  ;;  %v3013_v18 = vsub.s32 7, %v858_v8 }
 0x4c5   : > { %854 = vperm.xlu0 %2275, %v845_v6   ;;  %v860_v19 = vrot.slane %v846_v13, %v2999_v9  ;;  %v872_v20 = vrot.slane %v846_v13, %v3001_v10  ;;  %v885_v21 = vrot.slane %v846_v13, %v3003_v11  ;;  %v898_v22 = vrot.slane %v846_v13, %v3005_v12 }
 0x4c6   : > { %v911_v23 = vrot.slane %v846_v13, %v3007_v14  ;;  %v924_v24 = vrot.slane %v846_v13, %v3009_v16  ;;  %v937_v25 = vrot.slane %v846_v13, %v3011_v17  ;;  %v950_v27 = vrot.slane %v846_v13, %v3013_v18 }
 0x540   : > { %v3022_v26 = vpop.permute.xlu0 %849 }
 0x541   : > { %v861_v28 = vmul.f32 %v860_v19, %v3022_v26  ;;  %v873_v29 = vmul.f32 %v872_v20, %v3022_v26  ;;  %v886_v30 = vmul.f32 %v885_v21, %v3022_v26  ;;  %v899_v31 = vmul.f32 %v898_v22, %v3022_v26 }
 0x542   : > { %v912_v32 = vmul.f32 %v911_v23, %v3022_v26  ;;  %v925_v33 = vmul.f32 %v924_v24, %v3022_v26  ;;  %v938_v37 = vmul.f32 %v937_v25, %v3022_v26  ;;  %v951_v39 = vmul.f32 %v950_v27, %v3022_v26 }
 0x543   : > { %v863_v34 = vmul.f32 1.442695, %v861_v28  ;;  %v875_v35 = vmul.f32 1.442695, %v873_v29  ;;  %v888_v36 = vmul.f32 1.442695, %v886_v30 }
 0x544   : > { %v901_v38 = vmul.f32 1.442695, %v899_v31  ;;  %v3033_v40 = vpop.permute.xlu0 %854  ;;  %v914_v41 = vmul.f32 1.442695, %v912_v32  ;;  %v927_v43 = vmul.f32 1.442695, %v925_v33 }
 0x545   : > { %2276 = vpow2.f32 %v863_v34  ;;  %v862_v42 = vmul.f32 %v860_v19, %v3033_v40  ;;  %v874_v44 = vmul.f32 %v872_v20, %v3033_v40  ;;  %v940_v45 = vmul.f32 1.442695, %v938_v37 }
 0x546   : > { %2278 = vpow2.f32 %v875_v35  ;;  %v887_v46 = vmul.f32 %v885_v21, %v3033_v40  ;;  %v953_v47 = vmul.f32 1.442695, %v951_v39  ;;  %v900_v48 = vmul.f32 %v898_v22, %v3033_v40 }
 0x547   : > { %2280 = vpow2.f32 %v888_v36  ;;  %v865_v49 = vmul.f32 1.442695, %v862_v42  ;;  %v913_v50 = vmul.f32 %v911_v23, %v3033_v40  ;;  %v877_v51 = vmul.f32 1.442695, %v874_v44 }
 0x548   : > { %2282 = vpow2.f32 %v901_v38  ;;  %v926_v52 = vmul.f32 %v924_v24, %v3033_v40  ;;  %v890_v53 = vmul.f32 1.442695, %v887_v46  ;;  %v939_v54 = vmul.f32 %v937_v25, %v3033_v40 }
 0x549   : > { %2284 = vpow2.f32 %v914_v41  ;;  %v903_v55 = vmul.f32 1.442695, %v900_v48  ;;  %v952_v56 = vmul.f32 %v950_v27, %v3033_v40  ;;  %v916_v57 = vmul.f32 1.442695, %v913_v50 }
 0x54a   : > { %2286 = vpow2.f32 %v927_v43  ;;  %v929_v58 = vmul.f32 1.442695, %v926_v52  ;;  %v942_v60 = vmul.f32 1.442695, %v939_v54 }
 0x54b   : > { %2288 = vpow2.f32 %v940_v45  ;;  %v955_v62 = vmul.f32 1.442695, %v952_v56 }
 0x54c   : > { %2290 = vpow2.f32 %v953_v47 }
 0x54d   : > { %2292 = vpow2.f32 %v865_v49 }
 0x54e   : > { %2294 = vpow2.f32 %v877_v51 }
 0x54f   : > { %v2277_v59 = vpop.eup %2276  ;;  %2296 = vpow2.f32 %v890_v53 }
 0x550   : > { %v2279_v61 = vpop.eup %2278  ;;  %867 = vst.msk [vmem:[#allocation9] sm:$0xff] %vm601_vm2, %v2277_v59  ;;  %2298 = vpow2.f32 %v903_v55 }
 0x551   : > { %v2281_v63 = vpop.eup %2280  ;;  %880 = vst.msk [vmem:[#allocation9 + $0x10] sm:$0xff] %vm601_vm2, %v2279_v61  ;;  %2300 = vpow2.f32 %v916_v57 }
 0x552   : > { %v2283_v2 = vpop.eup %2282  ;;  %893 = vst.msk [vmem:[#allocation9 + $0x20] sm:$0xff] %vm601_vm2, %v2281_v63  ;;  %2302 = vpow2.f32 %v929_v58 }
 0x553   : > { %v2285_v3 = vpop.eup %2284  ;;  %906 = vst.msk [vmem:[#allocation9 + $0x30] sm:$0xff] %vm601_vm2, %v2283_v2  ;;  %2304 = vpow2.f32 %v942_v60 }
 0x554   : > { %v2287_v4 = vpop.eup %2286  ;;  %919 = vst.msk [vmem:[#allocation9 + $0x40] sm:$0xff] %vm601_vm2, %v2285_v3  ;;  %2306 = vpow2.f32 %v955_v62 }
 0x555   : > { %v2289_v5 = vpop.eup %2288  ;;  %932 = vst.msk [vmem:[#allocation9 + $0x50] sm:$0xff] %vm601_vm2, %v2287_v4 }
 0x556   : > { %v2291_v6 = vpop.eup %2290  ;;  %945 = vst.msk [vmem:[#allocation9 + $0x60] sm:$0xff] %vm601_vm2, %v2289_v5 }
 0x557   : > { %v2293_v7 = vpop.eup %2292  ;;  %958 = vst.msk [vmem:[#allocation9 + $0x70] sm:$0xff] %vm601_vm2, %v2291_v6 }
 0x558   : > { %v2295_v8 = vpop.eup %2294  ;;  %868 = vst.msk [vmem:[#allocation9 + $0x8] sm:$0xff] %vm601_vm2, %v2293_v7 }
 0x559   : > { %v2297_v13 = vpop.eup %2296  ;;  %881 = vst.msk [vmem:[#allocation9 + $0x18] sm:$0xff] %vm601_vm2, %v2295_v8 }
 0x55a   : > { %v2299_v19 = vpop.eup %2298  ;;  %894 = vst.msk [vmem:[#allocation9 + $0x28] sm:$0xff] %vm601_vm2, %v2297_v13 }
 0x55b   : > { %v2301_v20 = vpop.eup %2300  ;;  %907 = vst.msk [vmem:[#allocation9 + $0x38] sm:$0xff] %vm601_vm2, %v2299_v19 }
 0x55c   : > { %v2303_v21 = vpop.eup %2302  ;;  %920 = vst.msk [vmem:[#allocation9 + $0x48] sm:$0xff] %vm601_vm2, %v2301_v20 }
 0x55d   : > { %v2305_v22 = vpop.eup %2304  ;;  %933 = vst.msk [vmem:[#allocation9 + $0x58] sm:$0xff] %vm601_vm2, %v2303_v21 }
 0x55e   : > { %v2307_v23 = vpop.eup %2306  ;;  %946 = vst.msk [vmem:[#allocation9 + $0x68] sm:$0xff] %vm601_vm2, %v2305_v22 }
 0x55f   : > { %959 = vst.msk [vmem:[#allocation9 + $0x78] sm:$0xff] %vm601_vm2, %v2307_v23 }
 0x560 LB: >> { %s3065_s14 = sshll.u32 %s2636_s20, 3  ;;  %p967_p10 = scmp.lt.s32.totalorder %s2636_s20, 0  ;;  %s2636_s20 = sphi %s3059_s20, %s3406_s20  }
 0x561   : >> { %s968_s11 = ssub.s32 0, %s2636_s20  ;;  %s979_s26 = sadd.s32 1, %s2636_s20  }
 0x562   : >> { %s1946_s27 = smin.u32 %s2636_s20, %s968_s11  ;;  %p3075_p4 = scmp.ge.s32.totalorder %s979_s26, 2 }
 0x563   : >> { %s970_s23 = sand.u32 1, %s1946_s27   ;;  %s1722_s25 = scalar_lea.vmem (!%p3075_p4), [#allocation6], %s3065_s14 }
 0x564   : >> { %s971_s17 = ssub.s32 0, %s970_s23  ;;  %983 = sbr.rel (%p3075_p4) target bundleno = 1414 (0x586), region = 103  ;;  %v1951_v24 = vld [vmem:[%s1722_s25 + $0x8] sm:$0xff] (!%p3075_p4) }
 0x565   : >> { %s3428_s17 = smov (!%p967_p10, %s971_s17), %s970_s23  ;;  %v991_v25 = vrot.slane (!%p3075_p4), %v1951_v24, %v2999_v9  ;;  %v1006_v27 = vrot.slane (!%p3075_p4), %v1951_v24, %v3001_v10  ;;  %v1021_v28 = vrot.slane (!%p3075_p4), %v1951_v24, %v3003_v11  ;;  %v1036_v29 = vrot.slane (!%p3075_p4), %v1951_v24, %v3005_v12 }
 0x566   : >> { %p1948_p12 = scmp.lt.s32.totalorder %s3428_s17, 0  ;;  %s977_s19 = sadd.s32 2, %s3428_s17  ;;  %v1051_v30 = vrot.slane (!%p3075_p4), %v1951_v24, %v3007_v14  ;;  %v1066_v37 = vrot.slane (!%p3075_p4), %v1951_v24, %v3009_v16  ;;  %v1081_v47 = vrot.slane (!%p3075_p4), %v1951_v24, %v3011_v17  ;;  %v1096_v52 = vrot.slane (!%p3075_p4), %v1951_v24, %v3013_v18 }
 0x567   : >> { %v992_v31 = vmul.f32 (!%p3075_p4), %v991_v25, %v3022_v26  ;;  %v993_v32 = vmul.f32 (!%p3075_p4), %v991_v25, %v3033_v40  ;;  %v1007_v33 = vmul.f32 (!%p3075_p4), %v1006_v27, %v3022_v26  ;;  %v1008_v34 = vmul.f32 (!%p3075_p4), %v1006_v27, %v3033_v40 }
 0x568   : >> { %s3430_s19 = smov (!%p1948_p12, %s977_s19), %s3428_s17  ;;  %v1022_v35 = vmul.f32 (!%p3075_p4), %v1021_v28, %v3022_v26  ;;  %v1023_v36 = vmul.f32 (!%p3075_p4), %v1021_v28, %v3033_v40  ;;  %v1037_v42 = vmul.f32 (!%p3075_p4), %v1036_v29, %v3022_v26  ;;  %v1038_v44 = vmul.f32 (!%p3075_p4), %v1036_v29, %v3033_v40 }
 0x569   : >> { %v994_v38 = vmul.f32 (!%p3075_p4), 1.442695, %v992_v31  ;;  %v996_v39 = vmul.f32 (!%p3075_p4), 1.442695, %v993_v32  ;;  %v1009_v41 = vmul.f32 (!%p3075_p4), 1.442695, %v1007_v33  ;;  %v1052_v46 = vmul.f32 (!%p3075_p4), %v1051_v30, %v3022_v26 }
 0x56a   : >> { %v1011_v43 = vmul.f32 (!%p3075_p4), 1.442695, %v1008_v34  ;;  %v1024_v45 = vmul.f32 (!%p3075_p4), 1.442695, %v1022_v35  ;;  %v1026_v48 = vmul.f32 (!%p3075_p4), 1.442695, %v1023_v36  ;;  %v1053_v49 = vmul.f32 (!%p3075_p4), %v1051_v30, %v3033_v40 }
 0x56b   : >> { %2308 = vpow2.f32 %v994_v38  ;;  %s984_s2 = ssub.s32 1, %s3430_s19  ;;  %v1039_v50 = vmul.f32 1.442695, %v1037_v42  ;;  %v1067_v51 = vmul.f32 %v1066_v37, %v3022_v26  ;;  %v1041_v53 = vmul.f32 1.442695, %v1038_v44 }
 0x56c   : >> { %2310 = vpow2.f32 %v996_v39  ;;  %v1068_v54 = vmul.f32 %v1066_v37, %v3033_v40  ;;  %v1054_v55 = vmul.f32 1.442695, %v1052_v46  ;;  %v1082_v56 = vmul.f32 %v1081_v47, %v3022_v26  ;;  %s2038_s28 = sshll.u32 %s984_s2, 7 }
 0x56d   : >> { %2312 = vpow2.f32 %v1009_v41  ;;  %v1056_v57 = vmul.f32 1.442695, %v1053_v49  ;;  %v1083_v58 = vmul.f32 %v1081_v47, %v3033_v40  ;;  %v1069_v59 = vmul.f32 1.442695, %v1067_v51  ;;  %s3107_s22 = scalar_lea.vmem [#allocation9], %s2038_s28 }
 0x56e   : >> { %2314 = vpow2.f32 %v1011_v43  ;;  %v1097_v60 = vmul.f32 %v1096_v52, %v3022_v26  ;;  %v1071_v61 = vmul.f32 1.442695, %v1068_v54  ;;  %v1098_v62 = vmul.f32 %v1096_v52, %v3033_v40 }
 0x56f   : >> { %2316 = vpow2.f32 %v1024_v45  ;;  %v1084_v63 = vmul.f32 1.442695, %v1082_v56  ;;  %v1086_v2 = vmul.f32 1.442695, %v1083_v58 }
 0x570   : >> { %2318 = vpow2.f32 %v1026_v48  ;;  %v1099_v4 = vmul.f32 1.442695, %v1097_v60  ;;  %v1101_v6 = vmul.f32 1.442695, %v1098_v62 }
 0x571   : >> { %2320 = vpow2.f32 %v1039_v50 }
 0x572   : >> { %2322 = vpow2.f32 %v1041_v53 }
 0x573   : >> { %2324 = vpow2.f32 %v1054_v55 }
 0x574   : >> { %2326 = vpow2.f32 %v1056_v57 }
 0x575   : >> { %v2309_v3 = vpop.eup %2308  ;;  %2328 = vpow2.f32 %v1069_v59 }
 0x576   : >> { %v2311_v5 = vpop.eup %2310  ;;  %1001 = vst.msk [vmem:[%s3107_s22] sm:$0xff] %vm601_vm2, %v2309_v3  ;;  %2330 = vpow2.f32 %v1071_v61 }
 0x577   : >> { %v2313_v7 = vpop.eup %2312  ;;  %1002 = vst.msk [vmem:[%s3107_s22 + $0x8] sm:$0xff] %vm601_vm2, %v2311_v5  ;;  %2332 = vpow2.f32 %v1084_v63 }
 0x578   : >> { %v2315_v8 = vpop.eup %2314  ;;  %1956 = vst.msk [vmem:[%s3107_s22 + $0x10] sm:$0xff] %vm601_vm2, %v2313_v7  ;;  %2334 = vpow2.f32 %v1086_v2 }
 0x579   : >> { %v2317_v13 = vpop.eup %2316  ;;  %1957 = vst.msk [vmem:[%s3107_s22 + $0x18] sm:$0xff] %vm601_vm2, %v2315_v8  ;;  %2336 = vpow2.f32 %v1099_v4 }
 0x57a   : >> { %v2319_v19 = vpop.eup %2318  ;;  %1960 = vst.msk [vmem:[%s3107_s22 + $0x20] sm:$0xff] %vm601_vm2, %v2317_v13  ;;  %2338 = vpow2.f32 %v1101_v6 }
 0x57b   : >> { %v2321_v20 = vpop.eup %2320  ;;  %1961 = vst.msk [vmem:[%s3107_s22 + $0x28] sm:$0xff] %vm601_vm2, %v2319_v19 }
 0x57c   : >> { %v2323_v21 = vpop.eup %2322  ;;  %1964 = vst.msk [vmem:[%s3107_s22 + $0x30] sm:$0xff] %vm601_vm2, %v2321_v20 }
 0x57d   : >> { %v2325_v22 = vpop.eup %2324  ;;  %1965 = vst.msk [vmem:[%s3107_s22 + $0x38] sm:$0xff] %vm601_vm2, %v2323_v21 }
 0x57e   : >> { %v2327_v23 = vpop.eup %2326  ;;  %1968 = vst.msk [vmem:[%s3107_s22 + $0x40] sm:$0xff] %vm601_vm2, %v2325_v22 }
 0x57f   : >> { %v2329_v24 = vpop.eup %2328  ;;  %1969 = vst.msk [vmem:[%s3107_s22 + $0x48] sm:$0xff] %vm601_vm2, %v2327_v23 }
 0x580   : >> { %v2331_v25 = vpop.eup %2330  ;;  %1972 = vst.msk [vmem:[%s3107_s22 + $0x50] sm:$0xff] %vm601_vm2, %v2329_v24 }
 0x581   : >> { %v2333_v27 = vpop.eup %2332  ;;  %1973 = vst.msk [vmem:[%s3107_s22 + $0x58] sm:$0xff] %vm601_vm2, %v2331_v25 }
 0x582   : >> { %v2335_v28 = vpop.eup %2334  ;;  %1976 = vst.msk [vmem:[%s3107_s22 + $0x60] sm:$0xff] %vm601_vm2, %v2333_v27 }
 0x583   : >> { %v2337_v29 = vpop.eup %2336  ;;  %1977 = vst.msk [vmem:[%s3107_s22 + $0x68] sm:$0xff] %vm601_vm2, %v2335_v28 }
 0x584   : >> { %v2339_v30 = vpop.eup %2338  ;;  %1980 = vst.msk [vmem:[%s3107_s22 + $0x70] sm:$0xff] %vm601_vm2, %v2337_v29 }
 0x585   : >> { %1981 = vst.msk [vmem:[%s3107_s22 + $0x78] sm:$0xff] %vm601_vm2, %v2339_v30 }
 0x586 PF: >> { %s1113_s16 = scalar_lea.vmem [#allocation7], %s3065_s14  ;;  %v2652_v32 = vmov 0   ;;  %s1147_s29 = scalar_lea.vmem [#allocation8], %s3065_s14  ;;  %v2653_v34 = vmov 1   ;;  %v2654_v39 = vmov 2   ;;  %v2655_v41 = vmov 6   ;;  %2087 = vmatprep.subr.bf16.mxu0 (%p3075_p4), %v2645_v15  ;;  %2095 = vmatprep.mubr.msk.bf16.mxu0 (%p3075_p4), %vm2646_vm1, %v2645_v15 }
 0x587   : >> { %v1114_v31 = vld [vmem:[%s1113_s16] sm:$0xff]  ;;  %2340 = vset.pattern.permute.xlu1 %v2652_v32  ;;  %v2656_v42 = vmov 3   ;;  %v2657_v43 = vmov 4   ;;  %v2658_v44 = vmov 5   ;;  %v2659_v45 = vmov 7   ;;  %s1108_s13 = scalar_lea.vmem [#allocation6], %s3065_s14  ;;  %s3406_s20 = smov %s979_s26 }
 0x588   : >> { %1115 = vxpose.xlu0.b32.start.end [1/1] (short) (narrow) %v1114_v31, 16  ;;  %v1148_v33 = vld [vmem:[%s1147_s29] sm:$0xff]  ;;  %s1110_s11 = scalar_lea.vmem [#allocation4], %s3065_s14  ;;  %s2046_s27 = sshll.u32 %s3430_s19, 7  ;;  %v1181_v51 = vld [vmem:[#allocation10] sm:$0xff]  ;;  %vm1230_vm12 = vcmask 516096  }
 0x589   : >> { %v1109_v46 = vld [vmem:[%s1108_s13] sm:$0xff]  ;;  %s3147_s23 = scalar_lea.vmem [#allocation9], %s2046_s27  ;;  %s3214_s17 = scalar_lea.vmem [#allocation11], %s3065_s14 }
 0x58a   : >> { %v1111_v47 = vld [vmem:[%s1110_s11] sm:$0xff]  ;;  %s2034_s29 = sshll.u32 (%p3075_p4), %s2620_s21, 2  ;;  %s1677_s27 = sshll.u32 (%p3075_p4), %s2957_s24, 4  ;;  %s3296_s27 = int_to_ptr.vmem [resolvable:$true] %s1677_s27 }
 0x58b   : >> { %v1112_v48 = vmul.f32 %v1111_v47, %v1109_v46  ;;  %v1553_v26 = vld [vmem:[#allocation4] sm:$0xff] (%p3075_p4)  ;;  %s1674_s13 = sadd.s32 (%p3075_p4), %s2034_s29, %s2921_s1  ;;  %s3407_s14 = sld [smem:[#allocation37_spill]] (%p3075_p4) }
 0x58c   : >> { %v1186_v52 = vld [vmem:[%s3147_s23] sm:$0xff]  ;;  %v1986_v58 = vld [vmem:[%s3147_s23 + $0x10] sm:$0xff]  ;;  %s2035_s11 = sshll.u32 (%p3075_p4), %s1674_s13, 7  ;;  %s3305_s21 = scalar_lea.sflag (%p3075_p4), [#allocation14], %s469_s30 }
 0x58d   : >> { %1149 = vxpose.xlu0.b32.start.end [1/1] (short) (narrow) %v1148_v33, 16  ;;  %v1203_v49 = vrot.slane %v1112_v48, %v2999_v9  ;;  %v1188_v54 = vmul.f32 %v1186_v52, %v1181_v51  ;;  %v1250_v57 = vrot.slane %v1112_v48, %v3001_v10  ;;  %v1992_v62 = vld [vmem:[%s3147_s23 + $0x20] sm:$0xff]  ;;  %v1295_v63 = vrot.slane %v1112_v48, %v3003_v11  ;;  %v1998_v6 = vld [vmem:[%s3147_s23 + $0x30] sm:$0xff]  ;;  %s2522_s1 = scalar_lea.vmem (%p3075_p4), %s3296_s27, 256  ;;  %p3408_p6 = scmp.ne.s32.totalorder (%p3075_p4), %s3392_s12, 0 }
 0x58e   : >> { %v3159_v7 = vrot.slane %v1112_v48, %v3005_v12  ;;  %v3163_v21 = vrot.slane %v1112_v48, %v3007_v14  ;;  %v2004_v22 = vld [vmem:[%s3147_s23 + $0x40] sm:$0xff]  ;;  %v2010_v28 = vld [vmem:[%s3147_s23 + $0x50] sm:$0xff]  ;;  %v3172_v29 = vrot.slane %v1112_v48, %v3009_v16  ;;  %v2373_v12 = vld [vmem:[%s3367_s10 + $0x18] sm:$0xff] (%p3075_p4)   ;;  %p2523_p5 = scmp.ne.s32.totalorder (%p3075_p4), %s3296_s27, %s2522_s1  ;;  %s2660_s25 = smov (%p3075_p4), [#allocation21]  }
 0x58f   : >> { %v1182_v52 = vld [vmem:[#allocation10 + $0x8] sm:$0xff]  ;;  %v2026_v40 = vld [vmem:[%s3366_s9] ss:$0 sm:$0xff] (%p3075_p4)  ;;  %s2526_s2 = sshll.u32 (%p3075_p4), %s2660_s25, 4  ;;  %s2527_s2 = int_to_ptr.vmem [resolvable:$false] %s2526_s2 }
 0x590   : > { %v2372_v9 = vld [vmem:[%s3367_s10 + $0x10] sm:$0xff] (%p3075_p4)   ;;  %p2524_p7 = pnand (%p3075_p4), %p2523_p5, %p3408_p6  ;;  %s2528_s20 = scalar_lea.vmem (%p3075_p4), %s2527_s2, 512 }
 0x591   : > { %s3294_s19 = scalar_lea.hbm (%p3075_p4), %s3407_s14, %s2035_s11  ;;  %p2529_p11 = scmp.lt.s32.totalorder (%p3075_p4), %s3296_s27, %s2527_s2 }
 0x592   : > { %p2525_p9 = pneg (%p3075_p4), %p2524_p7  ;;  %p2530_p13 = scmp.lt.s32.totalorder (%p3075_p4), %s2528_s20, %s2522_s1 }
 0x594   : > { %p2531_p1 = por (%p3075_p4), %p2530_p13, %p2529_p11 }
 0x596   : > { %p2532_p3 = pnand (%p3075_p4), %p2531_p1, %p2525_p9 }
 0x5b6   : >> { %2348 = vset.pattern.permute.xlu0 %v2653_v34 }
 0x608   : >> { %v1131_v35 = vpop.trf.xlu0 }
 0x609   : >> { %1192 = vperm.xlu1 %2340, %v1131_v35  }
 0x60c   : >> { %v1132_v36 = vpop.trf.xlu0 }
 0x610   : >> { %v1165_v37 = vpop.trf.xlu0 }
 0x611   : >> { %1256 = vperm.xlu0 %2348, %v1165_v37   ;;  %1210 = vperm.xlu1 %2340, %v1165_v37  }
 0x614   : >> { %v1166_v38 = vpop.trf.xlu0 }
 0x615   : >> { %2352 = vset.pattern.permute.xlu0 %v2652_v32  ;;  %2341 = vset.pattern.permute.xlu1 %v2653_v34 }
 0x616   : >> { %1240 = vperm.xlu1 %2341, %v1131_v35   ;;  %1215 = vperm.xlu0 %2352, %v1166_v38  }
 0x61a   : >> { %2342 = vset.pattern.permute.xlu1 %v2654_v39  ;;  %2358 = vset.pattern.permute.xlu0 %v2655_v41 }
 0x61b   : >> { %1285 = vperm.xlu1 %2342, %v1131_v35   ;;  %1469 = vperm.xlu0 %2358, %v1132_v36  }
 0x61f   : >> { %2343 = vset.pattern.permute.xlu1 %v2656_v42  ;;  %2361 = vset.pattern.permute.xlu0 %v2654_v39 }
 0x620   : >> { %1330 = vperm.xlu1 %2343, %v1131_v35   ;;  %1305 = vperm.xlu0 %2361, %v1166_v38  }
 0x624   : >> { %2344 = vset.pattern.permute.xlu1 %v2657_v43  ;;  %2363 = vset.pattern.permute.xlu0 %v2657_v43 }
 0x625   : >> { %1375 = vperm.xlu1 %2344, %v1131_v35   ;;  %1391 = vperm.xlu0 %2363, %v1165_v37  }
 0x629   : >> { %2345 = vset.pattern.permute.xlu1 %v2658_v44  ;;  %2366 = vset.pattern.permute.xlu0 %v2658_v44 }
 0x62a   : >> { %1420 = vperm.xlu1 %2345, %v1131_v35   ;;  %1440 = vperm.xlu0 %2366, %v1166_v38  }
 0x62e   : >> { %2346 = vset.pattern.permute.xlu1 %v2655_v41  ;;  %2368 = vset.pattern.permute.xlu0 %v2659_v45 }
 0x62f   : >> { %1465 = vperm.xlu1 %2346, %v1131_v35   ;;  %1526 = vperm.xlu0 %2368, %v1165_v37  }
 0x633   : >> { %2347 = vset.pattern.permute.xlu1 %v2659_v45 }
 0x634   : >> { %1510 = vperm.xlu1 %2347, %v1131_v35  }
 0x638   : >> { %2349 = vset.pattern.permute.xlu1 %v2654_v39 }
 0x639   : >> { %1301 = vperm.xlu1 %2349, %v1165_v37  }
 0x63d   : >> { %2350 = vset.pattern.permute.xlu1 %v2656_v42 }
 0x63e   : >> { %1346 = vperm.xlu1 %2350, %v1165_v37  }
 0x642   : >> { %2351 = vset.pattern.permute.xlu1 %v2652_v32 }
 0x643   : >> { %1197 = vperm.xlu1 %2351, %v1132_v36  }
 0x647   : >> { %2353 = vset.pattern.permute.xlu1 %v2653_v34 }
 0x648   : >> { %1244 = vperm.xlu1 %2353, %v1132_v36  }
 0x64c   : >> { %2354 = vset.pattern.permute.xlu1 %v2654_v39 }
 0x64d   : >> { %1289 = vperm.xlu1 %2354, %v1132_v36  }
 0x651   : >> { %2355 = vset.pattern.permute.xlu1 %v2656_v42 }
 0x652   : >> { %1334 = vperm.xlu1 %2355, %v1132_v36  }
 0x656   : >> { %2356 = vset.pattern.permute.xlu1 %v2657_v43 }
 0x657   : >> { %1379 = vperm.xlu1 %2356, %v1132_v36  }
 0x65b   : >> { %2357 = vset.pattern.permute.xlu1 %v2658_v44 }
 0x65c   : >> { %1424 = vperm.xlu1 %2357, %v1132_v36  }
 0x660   : >> { %2359 = vset.pattern.permute.xlu1 %v2659_v45 }
 0x661   : >> { %1514 = vperm.xlu1 %2359, %v1132_v36   ;;  %v3182_v36 = vrot.slane %v1112_v48, %v3011_v17 }
 0x665   : >> { %2360 = vset.pattern.permute.xlu1 %v2653_v34  ;;  %v2016_v34 = vld [vmem:[%s3147_s23 + $0x60] sm:$0xff] }
 0x666   : >> { %1260 = vperm.xlu1 %2360, %v1166_v38  }
 0x66a   : >> { %2362 = vset.pattern.permute.xlu1 %v2656_v42  ;;  %v3188_v42 = vrot.slane %v1112_v48, %v3013_v18 }
 0x66b   : >> { %1350 = vperm.xlu1 %2362, %v1166_v38  }
 0x66f   : >> { %2364 = vset.pattern.permute.xlu1 %v2657_v43 }
 0x670   : >> { %1395 = vperm.xlu1 %2364, %v1166_v38  }
 0x674   : >> { %2365 = vset.pattern.permute.xlu1 %v2658_v44 }
 0x675   : >> { %1436 = vperm.xlu1 %2365, %v1165_v37  }
 0x679   : >> { %2367 = vset.pattern.permute.xlu1 %v2655_v41  ;;  %v2022_v41 = vld [vmem:[%s3147_s23 + $0x70] sm:$0xff] }
 0x67a   : >> { %1481 = vperm.xlu1 %2367, %v1165_v37  }
 0x67e   : >> { %1485 = vperm.xlu1 %2367, %v1166_v38  }
 0x682   : >> { %2369 = vset.pattern.permute.xlu1 %v2659_v45 }
 0x683   : >> { %1530 = vperm.xlu1 %2369, %v1166_v38  }
 0x688   : >> { %v1193_v50 = vpop.permute.xlu1 %1192 }
 0x689   : >> { %v1204_v53 = vmul.f32 %v1203_v49, %v1193_v50 }
 0x68b   : >> { %v1206_v56 = vadd.f32 %v1204_v53, %v1188_v54  ;;  %v1187_v53 = vld [vmem:[%s3147_s23 + $0x8] sm:$0xff] }
 0x68c   : >> { %v1189_v48 = vmul.f32 %v1187_v53, %v1182_v52  ;;  %v2005_v53 = vld [vmem:[%s3147_s23 + $0x48] sm:$0xff] }
 0x68d   : >> { %v1237_v60 = vmul.f32 %v1986_v58, %v1206_v56 }
 0x690   : >> { %v1211_v55 = vpop.permute.xlu1 %1210  ;;  %v3201_v54 = vpop.permute.xlu0 %1256 }
 0x695   : >> { %v1241_v59 = vpop.permute.xlu1 %1240 }
 0x696   : >> { %v1251_v61 = vmul.f32 %v1250_v57, %v1241_v59 }
 0x698   : >> { %v3154_v2 = vadd.f32 %v1251_v61, %v1237_v60  ;;  %v1987_v60 = vld [vmem:[%s3147_s23 + $0x18] sm:$0xff]  ;;  %v1218_v61 = vmul.f32 %v1211_v55, %v1206_v56 }
 0x69a   : >> { %v1286_v3 = vpop.permute.xlu1 %1285  ;;  %v1282_v4 = vmul.f32 %v1992_v62, %v3154_v2 }
 0x69b   : >> { %v1296_v5 = vmul.f32 %v1295_v63, %v1286_v3  ;;  %v1216_v3 = vpop.permute.xlu0 %1215 }
 0x69d   : >> { %v1298_v8 = vadd.f32 %v1296_v5, %v1282_v4 }
 0x69f   : >> { %v1331_v13 = vpop.permute.xlu1 %1330  ;;  %v1327_v19 = vmul.f32 %v1998_v6, %v1298_v8 }
 0x6a0   : >> { %v1341_v20 = vmul.f32 %v3159_v7, %v1331_v13 }
 0x6a2   : >> { %v3166_v23 = vadd.f32 %v1341_v20, %v1327_v19  ;;  %v1220_v19 = vsel %vm601_vm2, %v1218_v61, 0.0 }
 0x6a4   : >> { %v1376_v24 = vpop.permute.xlu1 %1375  ;;  %v1372_v25 = vmul.f32 %v2004_v22, %v3166_v23  ;;  %v1993_v22 = vld [vmem:[%s3147_s23 + $0x28] sm:$0xff] }
 0x6a5   : >> { %v1386_v27 = vmul.f32 %v3163_v21, %v1376_v24 }
 0x6a7   : >> { %v3174_v30 = vadd.f32 %v1386_v27, %v1372_v25  ;;  %v1470_v27 = vpop.permute.xlu0 %1469 }
 0x6a9   : >> { %v1421_v31 = vpop.permute.xlu1 %1420  ;;  %v1417_v32 = vmul.f32 %v2010_v28, %v3174_v30 }
 0x6aa   : >> { %v1431_v33 = vmul.f32 %v3172_v29, %v1421_v31 }
 0x6ac   : >> { %v3179_v35 = vadd.f32 %v1431_v33, %v1417_v32  ;;  %v1999_v32 = vld [vmem:[%s3147_s23 + $0x38] sm:$0xff] }
 0x6ae   : >> { %v1466_v37 = vpop.permute.xlu1 %1465  ;;  %v1462_v38 = vmul.f32 %v2016_v34, %v3179_v35 }
 0x6af   : >> { %v1476_v39 = vmul.f32 %v3182_v36, %v1466_v37  ;;  %v1306_v37 = vpop.permute.xlu0 %1305 }
 0x6b1   : >> { %v3190_v43 = vadd.f32 %v1476_v39, %v1462_v38 }
 0x6b3   : >> { %v1511_v44 = vpop.permute.xlu1 %1510  ;;  %v1507_v45 = vmul.f32 %v2022_v41, %v3190_v43 }
 0x6b4   : >> { %v1521_v46 = vmul.f32 %v3188_v42, %v1511_v44 }
 0x6b6   : >> { %v3194_v47 = vadd.f32 %v1521_v46, %v1507_v45 }
 0x6b8   : >> { %1547 = vst.msk [vmem:[#allocation10] sm:$0xff] %vm601_vm2, %v3194_v47  ;;  %v1302_v50 = vpop.permute.xlu1 %1301 }
 0x6b9   : >> { %v1308_v33 = vmul.f32 %v1302_v50, %v1298_v8 }
 0x6bb   : >> { %v1310_v46 = vsel %vm601_vm2, %v1308_v33, 0.0  ;;  %v1263_v33 = vmul.f32 %v3201_v54, %v3154_v2 }
 0x6bd   : >> { %v3198_v51 = vpop.permute.xlu1 %1346 }
 0x6c2   : >> { %v1198_v58 = vpop.permute.xlu1 %1197 }
 0x6c3   : >> { %v1205_v59 = vmul.f32 %v1203_v49, %v1198_v58 }
 0x6c5   : >> { %v1207_v62 = vadd.f32 %v1205_v59, %v1189_v48 }
 0x6c7   : >> { %v1219_v4 = vmul.f32 %v1216_v3, %v1207_v62  ;;  %v1245_v5 = vpop.permute.xlu1 %1244  ;;  %v1238_v6 = vmul.f32 %v1987_v60, %v1207_v62  ;;  %v2011_v62 = vld [vmem:[%s3147_s23 + $0x58] sm:$0xff] }
 0x6c8   : >> { %v1252_v13 = vmul.f32 %v1250_v57, %v1245_v5 }
 0x6c9   : >> { %v1221_v20 = vsel %vm601_vm2, %v1219_v4, 0.0 }
 0x6ca   : >> { %v1222_v24 = vadd.f32 %v1221_v20, %v1220_v19  ;;  %v1254_v25 = vadd.f32 %v1252_v13, %v1238_v6  ;;  %v2017_v20 = vld [vmem:[%s3147_s23 + $0x68] sm:$0xff] }
 0x6cc   : >> { %v1223_v28 = vrot.slane %v1222_v24, 4  ;;  %v1290_v31 = vpop.permute.xlu1 %1289  ;;  %v1283_v49 = vmul.f32 %v1993_v22, %v1254_v25 }
 0x6cd   : >> { %v1297_v55 = vmul.f32 %v1295_v63, %v1290_v31 }
 0x6ce   : >> { %v1224_v56 = vadd.f32 %v1223_v28, %v1222_v24 }
 0x6cf   : >> { %v1299_v34 = vadd.f32 %v1297_v55, %v1283_v49  ;;  %v2023_v55 = vld [vmem:[%s3147_s23 + $0x78] sm:$0xff] }
 0x6d0   : >> { %v1225_v38 = vrot.slane %v1224_v56, 2 }
 0x6d1   : >> { %v1309_v57 = vmul.f32 %v1306_v37, %v1299_v34  ;;  %v1335_v39 = vpop.permute.xlu1 %1334  ;;  %v1328_v41 = vmul.f32 %v1999_v32, %v1299_v34 }
 0x6d2   : >> { %v1226_v44 = vadd.f32 %v1225_v38, %v1224_v56  ;;  %v1342_v45 = vmul.f32 %v3159_v7, %v1335_v39 }
 0x6d3   : >> { %v1311_v52 = vsel %vm601_vm2, %v1309_v57, 0.0  ;;  %v1265_v57 = vsel %vm601_vm2, %v1263_v33, 0.0 }
 0x6d4   : >> { %v1227_v63 = vrot.slane %v1226_v44, 1  ;;  %v1312_v48 = vadd.f32 %v1311_v52, %v1310_v46  ;;  %v1344_v58 = vadd.f32 %v1342_v45, %v1328_v41  ;;  %v1392_v45 = vpop.permute.xlu0 %1391 }
 0x6d5   : >> { %v1398_v46 = vmul.f32 %v1392_v45, %v3174_v30 }
 0x6d6   : >> { %v1228_v8 = vadd.f32 %v1227_v63, %v1226_v44  ;;  %v1313_v50 = vrot.slane %v1312_v48, 4  ;;  %v1380_v59 = vpop.permute.xlu1 %1379  ;;  %v1373_v60 = vmul.f32 %v2005_v53, %v1344_v58 }
 0x6d7   : >> { %v1387_v61 = vmul.f32 %v3163_v21, %v1380_v59  ;;  %v1477_v21 = vmul.f32 %v3182_v36, %v1470_v27  ;;  %v1353_v27 = vmul.f32 %v3198_v51, %v3166_v23  ;;  %v1400_v23 = vsel %vm601_vm2, %v1398_v46, 0.0 }
 0x6d8   : >> { %1231 = vst.msk [vmem:[%s3214_s17] sm:$0x1] %vm1230_vm12, %v1228_v8  ;;  %v1314_v7 = vadd.f32 %v1313_v50, %v1312_v48  ;;  %v1441_v51 = vpop.permute.xlu0 %1440 }
 0x6d9   : >> { %v1389_v3 = vadd.f32 %v1387_v61, %v1373_v60  ;;  %v1355_v2 = vsel %vm601_vm2, %v1353_v27, 0.0 }
 0x6da   : >> { %v1315_v4 = vrot.slane %v1314_v7, 2 }
 0x6db   : >> { %v1425_v5 = vpop.permute.xlu1 %1424  ;;  %v1418_v6 = vmul.f32 %v2011_v62, %v1389_v3 }
 0x6dc   : >> { %v1316_v13 = vadd.f32 %v1315_v4, %v1314_v7  ;;  %v1432_v19 = vmul.f32 %v3172_v29, %v1425_v5 }
 0x6de   : >> { %v1317_v22 = vrot.slane %v1316_v13, 1  ;;  %v1434_v24 = vadd.f32 %v1432_v19, %v1418_v6 }
 0x6e0   : >> { %v1318_v28 = vadd.f32 %v1317_v22, %v1316_v13  ;;  %v1515_v31 = vpop.permute.xlu1 %1514  ;;  %v1463_v49 = vmul.f32 %v2017_v20, %v1434_v24  ;;  %v1444_v7 = vmul.f32 %v1441_v51, %v1434_v24 }
 0x6e1   : >> { %v1522_v32 = vmul.f32 %v3188_v42, %v1515_v31 }
 0x6e2   : >> { %1995 = vst.msk [vmem:[%s3214_s17 + $0x2] sm:$0x1] %vm1230_vm12, %v1318_v28  ;;  %v1479_v56 = vadd.f32 %v1477_v21, %v1463_v49  ;;  %v1446_v20 = vsel %vm601_vm2, %v1444_v7, 0.0  ;;  %v1549_v7 = vld [vmem:[#allocation5] sm:$0xff] (%p3075_p4) }
 0x6e4   : >> { %v1508_v34 = vmul.f32 %v2023_v55, %v1479_v56 }
 0x6e5   : >> { %v1261_v37 = vpop.permute.xlu1 %1260 }
 0x6e6   : >> { %v1264_v29 = vmul.f32 %v1261_v37, %v1254_v25  ;;  %v1524_v38 = vadd.f32 %v1522_v32, %v1508_v34 }
 0x6e8   : >> { %v1266_v36 = vsel %vm601_vm2, %v1264_v29, 0.0  ;;  %1548 = vst.msk [vmem:[#allocation10 + $0x8] sm:$0xff] %vm601_vm2, %v1524_v38 }
 0x6e9   : >> { %v1267_v39 = vadd.f32 %v1266_v36, %v1265_v57  ;;  %v1527_v36 = vpop.permute.xlu0 %1526 }
 0x6ea   : >> { %v1351_v41 = vpop.permute.xlu1 %1350 }
 0x6eb   : >> { %v1268_v44 = vrot.slane %v1267_v39, 4  ;;  %v1354_v42 = vmul.f32 %v1351_v41, %v1344_v58 }
 0x6ed   : >> { %v1269_v54 = vadd.f32 %v1268_v44, %v1267_v39  ;;  %v1356_v25 = vsel %vm601_vm2, %v1354_v42, 0.0  ;;  %v1533_v42 = vmul.f32 %v1527_v36, %v3194_v47 }
 0x6ee   : >> { %v1357_v52 = vadd.f32 %v1356_v25, %v1355_v2 }
 0x6ef   : >> { %v1270_v53 = vrot.slane %v1269_v54, 2  ;;  %v1396_v63 = vpop.permute.xlu1 %1395  ;;  %v1535_v46 = vsel %vm601_vm2, %v1533_v42, 0.0 }
 0x6f0   : >> { %v1358_v48 = vrot.slane %v1357_v52, 4  ;;  %v1399_v8 = vmul.f32 %v1396_v63, %v1389_v3 }
 0x6f1   : >> { %v1271_v50 = vadd.f32 %v1270_v53, %v1269_v54 }
 0x6f2   : >> { %v1359_v59 = vadd.f32 %v1358_v48, %v1357_v52  ;;  %v1401_v58 = vsel %vm601_vm2, %v1399_v8, 0.0 }
 0x6f3   : >> { %v1272_v60 = vrot.slane %v1271_v50, 1  ;;  %v1402_v61 = vadd.f32 %v1401_v58, %v1400_v23 }
 0x6f4   : >> { %v1360_v62 = vrot.slane %v1359_v59, 2  ;;  %v1437_v4 = vpop.permute.xlu1 %1436 }
 0x6f5   : >> { %v1273_v30 = vadd.f32 %v1272_v60, %v1271_v50  ;;  %v1403_v5 = vrot.slane %v1402_v61, 4  ;;  %v1443_v6 = vmul.f32 %v1437_v4, %v3179_v35  ;;  %v2370_v60 = vld [vmem:[%s3367_s10] sm:$0xff] (%p3075_p4)   ;;  %v1566_v4 = vsub.f32 (%p3075_p4), 0.0, %v1549_v7 }
 0x6f6   : >> { %v1361_v13 = vadd.f32 %v1360_v62, %v1359_v59  ;;  %2088 = vmatpush3.bf16.msra.mxu0 (%p3075_p4), %v2370_v60  ;;  %v1550_v62 = vld [vmem:[#allocation5 + $0x8] sm:$0xff] (%p3075_p4) }
 0x6f7   : >> { %1989 = vst.msk [vmem:[%s3214_s17 + $0x1] sm:$0x1] %vm1230_vm12, %v1273_v30  ;;  %v1404_v3 = vadd.f32 %v1403_v5, %v1402_v61  ;;  %v1445_v19 = vsel %vm601_vm2, %v1443_v6, 0.0  ;;  %v2371_v61 = vld [vmem:[%s3367_s10 + $0x8] sm:$0xff] (%p3075_p4)   ;;  %2089 = vmatprep.subr.bf16.mxu0 (%p3075_p4), %v2645_v15  ;;  %v1567_v30 = vsub.f32 (%p3075_p4), 0.0, %v1550_v62  ;;  %v1562_v6 = vmul.f32 (%p3075_p4), %v2026_v40, %v1553_v26 }
 0x6f8   : >> { %v1362_v22 = vrot.slane %v1361_v13, 1  ;;  %v1447_v21 = vadd.f32 %v1446_v20, %v1445_v19  ;;  %v1568_v10 = vmul.f32 (%p3075_p4), 1.442695, %v1566_v4  ;;  %v1554_v5 = vld [vmem:[#allocation4 + $0x8] sm:$0xff] (%p3075_p4) }
 0x6f9   : >> { %v1405_v28 = vrot.slane %v1404_v3, 2  ;;  %v1482_v31 = vpop.permute.xlu1 %1481  ;;  %v1570_v11 = vmul.f32 (%p3075_p4), 1.442695, %v1567_v30 }
 0x6fa   : >> { %v1363_v24 = vadd.f32 %v1362_v22, %v1361_v13  ;;  %v1448_v49 = vrot.slane %v1447_v21, 4  ;;  %v1488_v35 = vmul.f32 %v1482_v31, %v3190_v43  ;;  %2090 = vmatpush3.bf16.msra.mxu0 (%p3075_p4), %v2371_v61  ;;  %2374 = vpow2.f32 (%p3075_p4), %v1568_v10 }
 0x6fb   : >> { %v1406_v55 = vadd.f32 %v1405_v28, %v1404_v3  ;;  %2091 = vmatprep.subr.bf16.mxu0 (%p3075_p4), %v2645_v15  ;;  %2376 = vpow2.f32 (%p3075_p4), %v1570_v11  ;;  %v1563_v3 = vmul.f32 (%p3075_p4), %v2026_v40, %v1554_v5 }
 0x6fc   : >> { %2001 = vst.msk [vmem:[%s3214_s17 + $0x3] sm:$0x1] %vm1230_vm12, %v1363_v24  ;;  %v1449_v32 = vadd.f32 %v1448_v49, %v1447_v21  ;;  %v1490_v39 = vsel %vm601_vm2, %v1488_v35, 0.0 }
 0x6fd   : >> { %v1407_v33 = vrot.slane %v1406_v55, 1  ;;  %v1486_v34 = vpop.permute.xlu1 %1485 }
 0x6fe   : >> { %v1450_v37 = vrot.slane %v1449_v32, 2  ;;  %v1489_v29 = vmul.f32 %v1486_v34, %v1479_v56  ;;  %2092 = vmatpush3.bf16.msra.mxu0 (%p3075_p4), %v2372_v9 }
 0x6ff   : >> { %v1408_v57 = vadd.f32 %v1407_v33, %v1406_v55  ;;  %2093 = vmatprep.subr.bf16.mxu0 (%p3075_p4), %v2645_v15 }
 0x700   : >> { %v1451_v27 = vadd.f32 %v1450_v37, %v1449_v32  ;;  %v1491_v41 = vsel %vm601_vm2, %v1489_v29, 0.0 }
 0x701   : >> { %2007 = vst.msk [vmem:[%s3214_s17 + $0x4] sm:$0x1] %vm1230_vm12, %v1408_v57  ;;  %v1492_v44 = vadd.f32 %v1491_v41, %v1490_v39 }
 0x702   : >> { %v1452_v45 = vrot.slane %v1451_v27, 1  ;;  %v1531_v2 = vpop.permute.xlu1 %1530  ;;  %2094 = vmatpush3.bf16.msra.mxu0 (%p3075_p4), %v2373_v12 }
 0x703   : >> { %v1493_v43 = vrot.slane %v1492_v44, 4  ;;  %v1534_v54 = vmul.f32 %v1531_v2, %v1524_v38 }
 0x704   : >> { %v1453_v25 = vadd.f32 %v1452_v45, %v1451_v27  ;;  %v2375_v14 = vpop.eup (%p3075_p4), %2374 }
 0x705   : >> { %v1494_v56 = vadd.f32 %v1493_v43, %v1492_v44  ;;  %v1536_v52 = vsel %vm601_vm2, %v1534_v54, 0.0  ;;  %v2377_v16 = vpop.eup (%p3075_p4), %2376  ;;  %v1572_v17 = vadd.f32 (%p3075_p4), 1.0, %v2375_v14 }
 0x706   : >> { %2013 = vst.msk [vmem:[%s3214_s17 + $0x5] sm:$0x1] %vm1230_vm12, %v1453_v25  ;;  %v1537_v53 = vadd.f32 %v1536_v52, %v1535_v46  ;;  %v1573_v18 = vadd.f32 (%p3075_p4), 1.0, %v2377_v16 }
 0x707   : >> { %v1495_v63 = vrot.slane %v1494_v56, 2  ;;  %2378 = vrcp.f32 (%p3075_p4), %v1572_v17 }
 0x708   : >> { %v1538_v48 = vrot.slane %v1537_v53, 4  ;;  %2380 = vrcp.f32 (%p3075_p4), %v1573_v18 }
 0x709   : >> { %v1496_v8 = vadd.f32 %v1495_v63, %v1494_v56 }
 0x70a   : >> { %v1539_v50 = vadd.f32 %v1538_v48, %v1537_v53 }
 0x70b   : >> { %v1497_v47 = vrot.slane %v1496_v8, 1 }
 0x70c   : >> { %v1540_v23 = vrot.slane %v1539_v50, 2 }
 0x70d   : >> { %v1498_v51 = vadd.f32 %v1497_v47, %v1496_v8 }
 0x70e   : >> { %v1541_v59 = vadd.f32 %v1540_v23, %v1539_v50  ;;  %964 = sbr.rel (!%p3075_p4) target bundleno = 1376 (0x560), region = 175 }
 0x70f   : >> { %2019 = vst.msk [vmem:[%s3214_s17 + $0x6] sm:$0x1] %vm1230_vm12, %v1498_v51 }
 0x710   : >> { %v1542_v38 = vrot.slane %v1541_v59, 1 }
 0x711   : > { %v2379_v20 = vpop.eup (%p3075_p4), %2378 }
 0x712   : >> { %v1543_v58 = vadd.f32 %v1542_v38, %v1541_v59  ;;  %v2381_v21 = vpop.eup (%p3075_p4), %2380  ;;  %v1578_v28 = vmul.f32 (%p3075_p4), %v2379_v20, %v1549_v7 }
 0x713   : > { %v1579_v31 = vmul.f32 (%p3075_p4), %v2381_v21, %v1550_v62 }
 0x714   : >> { %2025 = vst.msk [vmem:[%s3214_s17 + $0x7] sm:$0x1] %vm1230_vm12, %v1543_v58 }
 0x71b   : > { %v1551_v13 = vld [vmem:[#allocation11] sm:$0xff]  ;;  %v1552_v15 = vld [vmem:[#allocation11 + $0x8] sm:$0xff] }
 0x71c   : > { %v1564_v19 = vadd.f32 %v1562_v6, %v1551_v13  ;;  %v1565_v22 = vadd.f32 %v1563_v3, %v1552_v15 }
 0x71e   : > { %v1580_v24 = vmul.f32 %v1578_v28, %v1564_v19  ;;  %v1581_v49 = vmul.f32 %v1579_v31, %v1565_v22 }
 0x720   : > { %v1582_v55 = vpack.c.bf16 %v1581_v49, %v1580_v24 }
 0x722   : > { %2096 = vmatmul.mubr.msk.bf16.vlgmr.msra.gmra.mrb[4].mxu0 %vm601_vm2, %v1582_v55 }
 0x7f5   : > { %v1652_v32 = vpop.f32.mrb[4].mxu0 }
 0x7f6   : > { %v1653_v35 = vadd.f32 %v1652_v32, %v2930_v0  ;;  %v2097_v33 = vpop.f32.mrb[5].mxu0 }
 0x7f7   : > { %v1655_v34 = vpop.f32.mrb[6].mxu0 }
 0x7f8   : > { %1659 = vst.msk [vmem:[%s2957_s24] sm:$0xff] %vm486_vm0, %v1653_v35  ;;  %v1656_v37 = vadd.f32 %v1655_v34, %v2932_v1  ;;  %v2098_v29 = vpop.f32.mrb[7].mxu0 }
 0x7fa   : > { %1660 = vst.msk [vmem:[%s2957_s24 + $0x8] sm:$0xff] %vm486_vm0, %v1656_v37 }
 0x7fb   : > { %2535 = shalt.err (!%p2532_p3)
}
 0x7fc   : > { %s2536_s30 = scalar_lea.hbm %s3294_s19, 256  ;;  %s2540_s15 = scalar_lea.hbm %s3407_s14, 1024 }
 0x7fd   : > { %p2537_p0 = scmp.ne.s32.totalorder %s3294_s19, %s2536_s30  ;;  %p2541_p10 = scmp.lt.u32.totalorder %s3294_s19, %s3407_s14 }
 0x7fe   : > { %p2542_p12 = scmp.lt.u32.totalorder %s2540_s15, %s2536_s30  ;;  %p2544_p5 = scmp.lt.u32.totalorder %s2536_s30, %s3294_s19 }
 0x7ff   : > { %p2538_p2 = pnand %p2537_p0, %p3408_p6 }
 0x800   : > { %p2543_p4 = por %p2542_p12, %p2541_p10 }
 0x801   : > { %p2539_p8 = pneg %p2538_p2 }
 0x802   : > { %p2545_p7 = por %p2544_p5, %p2543_p4 }
 0x804   : > { %p2546_p9 = pnand %p2545_p7, %p2539_p8 }
 0x806   : > { %2549 = shalt.err (!%p2546_p9)
}
 0x807   : > { %s2661_s16 = smov 128   ;;  %s2662_s29 = smov 8  }
 0x808   : > { %2119 = dma.vmem_to_hbm [thread:$0]  (%p3408_p6), %s3296_s27, 256, %s3294_s19, %s3305_s21, %s2661_s16, %s2661_s16, %s2662_s29  }
 0x809 PF: > { %s3409_s13 = sld [smem:[#allocation30_spill]]  ;;  %s3410_s11 = sld [smem:[#allocation26_spill]] }
 0x80a   : > { %s3411_s23 = sld [smem:[#allocation33_spill]] }
 0x80f   : > { %p2151_p11 = scmp.ge.s32.totalorder %s3409_s13, 2  ;;  %s1692_s17 = sand.u32 1, %s3410_s11  }
 0x810   : > { %p3412_p13 = scmp.ne.s32.totalorder %s3411_s23, 0  ;;  %s1693_s1 = scalar_lea.sflag [#allocation14], %s1692_s17 }
 0x812   : > { %p2138_p1 = pnand %p2151_p11, %p3412_p13 }
 0x814   : > { %2599 = dma.done.wait (!%p2138_p1), %s1693_s1, 256  }
 0x815   : > { %2601 = vsyncadd (!%p2138_p1), %s1693_s1, 4294967040  ;;  %s27_s24 = sadd.s32 1, %s3409_s13   ;;  %s3413_s25 = sld [smem:[#allocation27_spill]] }
 0x816   : > { %p24_p3 = scmp.ge.s32.totalorder %s27_s24, 6   ;;  %s3414_s19 = sld [smem:[#allocation34_spill]] }
 0x817   : > { %s3415_s20 = sld [smem:[#allocation28_spill]]  ;;  %s3416_s21 = sld [smem:[#allocation29_spill]] }
 0x818   : > { %s3417_s22 = sld [smem:[#allocation31_spill]]  ;;  %s3418_s23 = sld [smem:[#allocation32_spill]] }
 0x819   : > { %s3419_s17 = smov %s2608_s18  ;;  %26 = sbr.rel (!%p24_p3) target bundleno = 12 (0xc), region = 186 }
 0x81b   : > { %s3420_s18 = smov %s3413_s25 }
 0x820   :  { %1698 = vsyncpa [#allocation13], 1 }
 0x821   :  { %1700 = vsyncpa [#allocation13 + $0x1], 1 }
 0x822   :  { %1701 = vsyncpa [#allocation16], 1 }
 0x823   :  { %1702 = vsyncpa [#allocation19], 1 }
 0x824   :  { %1703 = vsyncpa [#allocation14], 1 }
 0x825   :  { %1705 = vsyncpa [#allocation14 + $0x1], 1 }

</bundles_post_ra>
